<compile_context>
chip_gen: v7x
topology: tpu7x:2x2x1
jax: 0.10.0
libtpu: 0.0.40
codegen_flags: <defaults>
</compile_context>

<pallas_src>
import jax
import jax.numpy as jnp
from jax.experimental import pallas as pl
from jax.experimental.pallas import tpu as pltpu


def _attention_pool_kernel(x_ref, w_ref, b_ref, o_ref):
    """out[b, s] = sum_e x[b, s, e] * w[0, e] + bias, written lane-dense."""
    x = x_ref[...]                 # (TB, TS, E) f32 activation tile
    w = w_ref[...]                 # (1, E) f32, broadcasts over (TB, TS, E)
    bias = b_ref[0, 0]             # scalar from SMEM
    scores = jnp.sum(x * w, axis=-1) + bias     # (TB, TS), f32 on VPU/XLU
    o_ref[...] = scores.astype(o_ref.dtype)


def _round_up(v, m):
    return (v + m - 1) // m * m


# Soft VMEM budget for one activation block (Pallas double-buffers inputs).
_X_BLOCK_BYTES = 4 * 1024 * 1024


def _pick_tiles(B, S, E, itemsize):
    # Lane (seq) tile: full S when small, else a multiple of 128.
    ts = S if S <= 512 else 512
    # Sublane (batch) tile: full B when it fits the budget, else a multiple of 8.
    row_bytes = max(1, ts * E * itemsize)
    max_tb = max(1, _X_BLOCK_BYTES // row_bytes)
    tb = B if B <= max_tb else max(8, (max_tb // 8) * 8)
    return tb, ts


def feature_attention_pooling(x, weight, bias, *, block_b=None, block_s=None):
    """Pallas forward for FeatureAttentionPooling.

    x:      (B, S, E) float32
    weight: (1, E)    float32   (torch nn.Linear(embed_size, 1).weight)
    bias:   (1,)      float32   (torch nn.Linear(embed_size, 1).bias)
    returns (B, S, 1) float32   (matches the PyTorch forward, which does not squeeze)
    """
    B, S, E = x.shape
    x = x.astype(jnp.float32)
    weight = weight.reshape(1, E).astype(jnp.float32)
    bias2d = bias.reshape(1, 1).astype(jnp.float32)

    tb_auto, ts_auto = _pick_tiles(B, S, E, x.dtype.itemsize)
    tb = tb_auto if block_b is None else block_b
    ts = ts_auto if block_s is None else block_s

    Bp = _round_up(B, tb)
    Sp = _round_up(S, ts)
    if (Bp, Sp) != (B, S):
        x = jnp.pad(x, ((0, Bp - B), (0, Sp - S), (0, 0)))

    grid = (Bp // tb, Sp // ts)

    out = pl.pallas_call(
        _attention_pool_kernel,
        out_shape=jax.ShapeDtypeStruct((Bp, Sp), jnp.float32),
        grid=grid,
        in_specs=[
            # Activation tile: pipelined across the grid.
            pl.BlockSpec((tb, ts, E), lambda i, j: (i, j, 0)),
            # Weight: constant index_map -> fetched once, VMEM-resident.
            pl.BlockSpec((1, E), lambda i, j: (0, 0)),
            # Bias scalar in SMEM, also resident across all steps.
            pl.BlockSpec((1, 1), lambda i, j: (0, 0),
                         memory_space=pltpu.MemorySpace.SMEM),
        ],
        # Lane-dense output tile: seq on the lane axis (width-1 dim re-added in
        # the wrapper), avoiding masked partial stores.
        out_specs=pl.BlockSpec((tb, ts), lambda i, j: (i, j)),
        compiler_params=pltpu.CompilerParams(
            dimension_semantics=("parallel", "parallel")),
    )(x, weight, bias2d)

    return out[:B, :S, None]


if __name__ == "__main__":
    key = jax.random.PRNGKey(0)
    kx, kw, kb, kx2 = jax.random.split(key, 4)

    # Case 1: tile-friendly shapes exercising a (2, 2) grid with pipelined,
    # lane-dense (8, 128) output tiles.
    B, S, E = 16, 256, 128
    bound = 1.0 / (E ** 0.5)
    x = jax.random.normal(kx, (B, S, E), jnp.float32)
    w = jax.random.uniform(kw, (1, E), jnp.float32, -bound, bound)
    b = jax.random.uniform(kb, (1,), jnp.float32, -bound, bound)

    out = jax.block_until_ready(
        feature_attention_pooling(x, w, b, block_b=8, block_s=128))
    ref = jnp.sum(x * w.reshape(1, 1, E), axis=-1, keepdims=True) + b
    assert out.shape == (B, S, 1)
    assert jnp.allclose(out, ref, atol=1e-4, rtol=1e-4)

    # Case 2: small ragged shapes (full-array blocks, padding path unused).
    B2, S2, E2 = 3, 10, 32
    x2 = jax.random.normal(kx2, (B2, S2, E2), jnp.float32)
    w2 = w[:, :E2]
    out2 = jax.block_until_ready(feature_attention_pooling(x2, w2, b))
    ref2 = jnp.sum(x2 * w2.reshape(1, 1, E2), axis=-1, keepdims=True) + b
    assert out2.shape == (B2, S2, 1)
    assert jnp.allclose(out2, ref2, atol=1e-4, rtol=1e-4)

    print("KERNEL_OK")
</pallas_src>

<mosaic_0001>
module attributes {stable_mosaic.version = 11 : i64} {
  func.func @_attention_pool_kernel(%arg0: i32, %arg1: i32, %arg2: memref<8x128x128xf32, #tpu.memory_space<vmem>>, %arg3: memref<1x128xf32, #tpu.memory_space<vmem>>, %arg4: memref<1x1xf32, #tpu.memory_space<smem>>, %arg5: memref<8x128xf32, #tpu.memory_space<vmem>>) attributes {dimension_semantics = [#tpu.dimension_semantics<parallel>, #tpu.dimension_semantics<parallel>], iteration_bounds = array<i64: 2, 2>, scalar_prefetch = 0 : i64, scratch_operands = 0 : i64, tpu.core_type = #tpu.core_type<tc>, window_params = [{transform_indices = @transform_0, window_bounds = array<i64: 8, 128, 128>}, {pipeline_mode = #tpu.pipeline_mode<synchronous>, transform_indices = @transform_1, window_bounds = array<i64: 1, 128>}, {transform_indices = @transform_2, window_bounds = array<i64: 1, 1>}, {transform_indices = @transform_3, window_bounds = array<i64: 8, 128>}]} {
    %c0 = arith.constant 0 : index
    %c0_0 = arith.constant 0 : index
    %c0_1 = arith.constant 0 : index
    %0 = vector.load %arg2[%c0, %c0_0, %c0_1] : memref<8x128x128xf32, #tpu.memory_space<vmem>>, vector<8x128x128xf32>
    %c0_2 = arith.constant 0 : index
    %c0_3 = arith.constant 0 : index
    %1 = vector.load %arg3[%c0_2, %c0_3] : memref<1x128xf32, #tpu.memory_space<vmem>>, vector<1x128xf32>
    %c0_4 = arith.constant 0 : index
    %c0_5 = arith.constant 0 : index
    %2 = memref.load %arg4[%c0_4, %c0_5] : memref<1x1xf32, #tpu.memory_space<smem>>
    %3 = vector.shape_cast %1 : vector<1x128xf32> to vector<1x1x128xf32>
    %4 = vector.broadcast %3 : vector<1x1x128xf32> to vector<8x128x128xf32>
    %5 = arith.mulf %0, %4 : vector<8x128x128xf32>
    %cst = arith.constant dense<0.000000e+00> : vector<8x128xf32>
    %6 = vector.multi_reduction <add>, %5, %cst [2] : vector<8x128x128xf32> to vector<8x128xf32>
    %7 = vector.broadcast %2 : f32 to vector<8x128xf32>
    %8 = arith.addf %6, %7 : vector<8x128xf32>
    %c0_6 = arith.constant 0 : index
    %c0_7 = arith.constant 0 : index
    %9 = vector.load %arg5[%c0_6, %c0_7] : memref<8x128xf32, #tpu.memory_space<vmem>>, vector<8x128xf32>
    tpu.vector_store %arg5[%c0_6, %c0_7], %8 {strides = array<i32>} : memref<8x128xf32, #tpu.memory_space<vmem>>, vector<8x128xf32>,
    return
  }
  func.func @transform_0(%arg0: i32, %arg1: i32) -> (i32, i32, i32) {
    %c0_i32 = arith.constant 0 : i32
    %c0_i32_0 = arith.constant 0 : i32
    return %arg0, %arg1, %c0_i32 : i32, i32, i32
  }
  func.func @transform_1(%arg0: i32, %arg1: i32) -> (i32, i32) {
    %c0_i32 = arith.constant 0 : i32
    %c0_i32_0 = arith.constant 0 : i32
    %c0_i32_1 = arith.constant 0 : i32
    return %c0_i32, %c0_i32_0 : i32, i32
  }
  func.func @transform_2(%arg0: i32, %arg1: i32) -> (i32, i32) {
    %c0_i32 = arith.constant 0 : i32
    %c0_i32_0 = arith.constant 0 : i32
    %c0_i32_1 = arith.constant 0 : i32
    return %c0_i32, %c0_i32_0 : i32, i32
  }
  func.func @transform_3(%arg0: i32, %arg1: i32) -> (i32, i32) {
    %c0_i32 = arith.constant 0 : i32
    return %arg0, %arg1 : i32, i32
  }
}

</mosaic_0001>

<bundles_post_ra>
// kernel: tpu_custom_call.1
= control target key start
LH: loop header
LB: loop body
LE: loop exit
PB: predicated region body
PF: predicated region fallthrough
CT: control target
= control target key end

     0   :  { %s3054_s0 = inlined_call_operand.hbm [shape: f32[16,256,128], index: 0, kind: input, shape index: {}]   ;;  %s3055_s1 = inlined_call_operand.hbm [shape: f32[1,128], index: 1, kind: input, shape index: {}]   ;;  %s3056_s2 = inlined_call_operand.<no memory space> [shape: f32[1,1], index: 2, kind: input, shape index: {}]   ;;  %s3057_s3 = inlined_call_operand.hbm [shape: f32[16,256], index: 3, kind: output, shape index: {}]  }
   0x1   :  { %3066 = sst [smem:[#allocation17_spill]] %s3055_s1 }
   0x2   :  { %8 = sst [smem:[#allocation2]] %s3056_s2 }
   0x3   :  { %9 = vsyncpa [#allocation4], 0 }
   0x4   :  { %11 = vsyncpa [#allocation4 + $0x1], 0 }
   0x5   :  { %12 = vsyncpa [#allocation7], 0 }
   0x6   :  { %13 = vsyncpa [#allocation5], 0 }
   0x7   :  { %15 = vsyncpa [#allocation5 + $0x1], 0  ;;  %s2102_s14 = smov 0   ;;  %s2104_s15 = smov 0  }
   0x8   :  { %s2106_s16 = smov 0   ;;  %s2108_s17 = smov 0  }
   0x9   :  { %s2110_s18 = smov 0   ;;  %s2112_s19 = smov 0  }
   0xa   :  { %s2114_s20 = smov 0   ;;  %s2116_s2 = smov 0  }
   0xb LB: > { %s1818_s21 = sadd.s32 4294967295, %s2069_s2   ;;  %s1819_s22 = sadd.s32 4294967294, %s2069_s2   ;;  %s2069_s2 = sphi %s2116_s2, %s21_s2   ;;  %s2065_s20 = sphi %s2114_s20, %s3091_s20   ;;  %s2061_s19 = sphi %s2112_s19, %s3090_s19   ;;  %s2057_s18 = sphi %s2110_s18, %s3089_s18   ;;  %s2053_s17 = sphi %s2108_s17, %s3088_s17   ;;  %s2049_s16 = sphi %s2106_s16, %s3087_s16   ;;  %s2045_s15 = sphi %s2104_s15, %s3086_s15   ;;  %s2041_s14 = sphi %s2102_s14, %s3085_s14  }
   0xc   : > { %s30_s23 = sadd.s32 1, %s2061_s19  ;;  %s33_s24 = sadd.s32 1, %s2065_s20 }
   0xd   : > { %p31_p0 = scmp.ge.s32.totalorder %s30_s23, 2  ;;  %s42_s25 = sadd.s32 1, %s2049_s16 }
   0xe   : > { %p49_p1 = scmp.ne.s32.totalorder %s2049_s16, %s2045_s15  ;;  %p50_p2 = scmp.eq.s32.totalorder %s2069_s2, 0 }
   0xf   : > { %s3093_s23 = smov (%p31_p0, %s30_s23), 0  ;;  %s3095_s24 = smov (!%p31_p0, %s33_s24), %s2065_s20 }
  0x10   : > { %3067 = sst [smem:[#allocation15_spill]] %s3093_s23  ;;  %s38_s26 = ssub.s32 %s2061_s19, %s3093_s23 }
  0x11   : > { %p2155_p3 = por %p50_p2, %p49_p1  ;;  %p35_p4 = scmp.ge.s32.totalorder %s3095_s24, 2 }
  0x12   : > { %p55_p5 = scmp.ne.s32.totalorder %s2045_s15, %s2041_s14  ;;  %p2161_p6 = scmp.eq.s32.totalorder %s1818_s21, 0 }
  0x13   : > { %s3068_s27 = scalar_select %p2155_p3, 1, 0 }
  0x14   : > { %s3069_s28 = scalar_select %p2161_p6, 1, 0 }
  0x15   : > { %p123_p7 = scmp.eq.s32.totalorder %s1818_s21, 3  ;;  %s3097_s24 = smov (%p35_p4, %s3095_s24), 0 }
  0x16   : > { %3070 = sst [smem:[#allocation16_spill]] %s3097_s24  ;;  %p2169_p8 = por %p2161_p6, %p55_p5 }
  0x17   : > { %p2173_p9 = por %p123_p7, %p49_p1  ;;  %s37_s4 = ssub.s32 %s2065_s20, %s3097_s24 }
  0x18   : > { %s3071_s29 = scalar_select %p2169_p8, 1, 0 }
  0x19   : > { %s3072_s30 = scalar_select %p2173_p9, 1, 0 }
  0x1a   : > { %p129_p10 = scmp.eq.s32.totalorder %s1819_s22, 3  ;;  %s39_s5 = sor.u32 %s38_s26, %s37_s4 }
  0x1b   : > { %p1820_p11 = scmp.ge.s32.totalorder %s2069_s2, 1  ;;  %p40_p12 = scmp.eq.s32.totalorder %s39_s5, 0 }
  0x1c   : > { %p2180_p13 = por %p129_p10, %p55_p5  ;;  %p136_p0 = scmp.lt.s32.totalorder %s2069_s2, 5 }
  0x1d   : > { %s2186_s7 = scalar_select %p40_p12, %s2049_s16, %s42_s25  }
  0x1e   : > { %s3073_s6 = scalar_select %p2180_p13, 1, 0 }
  0x1f   : > { %p2188_p2 = pnand %p1820_p11, %p136_p0  ;;  %s2071_s9 = smov [#allocation6]  }
  0x20   : > { %s149_s10 = sshll.u32 %s2071_s9, 4  ;;  %s3076_s1 = sld [smem:[#allocation17_spill]]  ;;  %s150_s10 = int_to_ptr.vmem [resolvable:$true] %s149_s10 }
  0x21   : > { %s3074_s8 = scalar_select %p2188_p2, 1, 0 }
  0x22   : > { %p1856_p1 = pneg %p2188_p2 }
  0x24   : > { %p2196_p4 = pnand %p1856_p1, %p2161_p6 }
  0x26   : > { %s1939_s21 = scalar_lea.hbm %s3076_s1, 16  ;;  %p1941_p7 = pneg %p2196_p4 }
  0x27   : > { %p1940_p5 = scmp.ne.s32.totalorder %s3076_s1, %s1939_s21  ;;  %p1946_p12 = scmp.lt.u32.totalorder %s1939_s21, %s3076_s1 }
  0x29   : > { %p1942_p10 = pnand %p1941_p7, %p1940_p5 }
  0x2b   : > { %p1943_p11 = pneg %p1942_p10 }
  0x2d   : > { %p1948_p0 = pnand %p1946_p12, %p1943_p11 }
  0x2f   : > { %1951 = shalt.err (!%p1948_p0)
}
  0x30   : > { %s1952_s5 = scalar_lea.vmem %s150_s10, 16  ;;  %s1959_s9 = scalar_lea.vmem %s150_s10, 32 }
  0x31   : > { %p1953_p1 = scmp.ne.s32.totalorder %s150_s10, %s1952_s5  ;;  %p1960_p6 = scmp.lt.s32.totalorder %s150_s10, %s150_s10 }
  0x32   : > { %p1961_p8 = scmp.lt.s32.totalorder %s1959_s9, %s1952_s5 }
  0x33   : > { %p1955_p13 = pnand %p1953_p1, %p1941_p7 }
  0x34   : > { %p1962_p2 = por %p1961_p8, %p1960_p6 }
  0x35   : > { %p1956_p9 = pneg %p1955_p13 }
  0x37   : > { %p1963_p3 = pnand %p1962_p2, %p1956_p9 }
  0x39   : > { %1966 = shalt.err (!%p1963_p3)
}
  0x3a   : > { %1859 = dma.hbm_to_vmem [thread:$0]  (!%p2196_p4), %s3076_s1, 16, %s150_s10, [#allocation7]  }
  0x3b   : > { %p1822_p5 = scmp.ge.s32.totalorder %s2069_s2, 4 }
  0x3d   : > { %159 = sbr.rel (%p1822_p5) target bundleno = 85 (0x55), region = 24 }
  0x44   : > { %s163_s21 = sand.u32 1, %s2049_s16   ;;  %s1825_s22 = sshll.u32 %s2061_s19, 4 }
  0x45   : > { %s1823_s25 = sshll.u32 %s163_s21, 10  ;;  %s1840_s26 = sshll.u32 %s2065_s20, 8 }
  0x46   : > { %s174_s11 = sadd.s32 %s1840_s26, %s1825_s22  ;;  %s167_s4 = scalar_lea.vmem [#allocation3], %s1823_s25 }
  0x47   : > { %s189_s5 = sshll.u32 %s167_s4, 4  ;;  %s1827_s10 = sshll.u32 %s174_s11, 7  ;;  %s190_s5 = int_to_ptr.vmem [resolvable:$true] %s189_s5 }
  0x48   : > { %p3077_p3 = scmp.ne.s32.totalorder %s3068_s27, 0  ;;  %s2072_s12 = smov 4096  }
  0x49   : > { %s2073_s1 = smov 2048   ;;  %s2074_s24 = smov 16  }
  0x4a   : > { %s1843_s9 = scalar_select %p3077_p3, [#allocation0], [#allocation11] }
  0x4b   : > { %1844 = sst [smem:[#allocation10]] (%p3077_p3), %s2072_s12  ;;  %s2075_s22 = smov 128  }
  0x4c   : > { %s181_s13 = sld [smem:[%s1843_s9]]   ;;  %s176_s11 = scalar_lea.hbm %s3054_s0, %s1827_s10 }
  0x4d   : > { %1845 = sst [smem:[#allocation10 + $0x1]] (%p3077_p3), %s2073_s1  ;;  %s2076_s4 = smov 8  }
  0x4e   : > { %1846 = sst [smem:[#allocation10 + $0x2]] (%p3077_p3), %s2074_s24  ;;  %s164_s23 = scalar_lea.sflag [#allocation4], %s163_s21 }
  0x4f   : > { %1847 = sst [smem:[#allocation10 + $0x3]] (%p3077_p3), %s2075_s22  ;;  %s2077_s1 = smov [#allocation9]  }
  0x50   : > { %1848 = sst [smem:[#allocation10 + $0x4]] (%p3077_p3), %s2075_s22 }
  0x51   : > { %1849 = sst [smem:[#allocation10 + $0x5]] (%p3077_p3), %s2076_s4 }
  0x52   : > { %s1828_s9 = sshll.u32 %s181_s13, 26 }
  0x53   : > { %s1829_s12 = sadd.s32 134217728, %s1828_s9 }
  0x54   : > { %1850 = dma.general (%p3077_p3), %s176_s11, 16384, %s190_s5, %s164_s23, %s2077_s1, [#allocation10], %s1829_s12, 0  }
  0x55 PF: > { %p3078_p6 = scmp.ne.s32.totalorder %s3074_s8, 0 }
  0x56   : > { %s2242_s24 = sand.u32 (!%p3078_p6), 1, %s2045_s15   ;;  %p3079_p8 = scmp.ne.s32.totalorder (!%p3078_p6), %s3071_s29, 0 }
  0x57   : > { %214 = sbr.rel (%p3078_p6) target bundleno = 517 (0x205), region = 32  ;;  %s1831_s10 = sshll.u32 (!%p3078_p6), %s2242_s24, 10 }
  0x58   : > { %s217_s22 = scalar_lea.sflag (!%p3078_p6), [#allocation4], %s2242_s24  ;;  %s2246_s25 = scalar_lea.vmem (!%p3078_p6), [#allocation3], %s1831_s10 }
  0x5e   : > { %2028 = dma.done.wait (%p3079_p8), %s217_s22, 16384  }
  0x5f   : > { %2030 = vsyncadd (%p3079_p8), %s217_s22, 4294950912  ;;  %p3080_p9 = scmp.ne.s32.totalorder %s3069_s28, 0 }
  0x61   : > { %2032 = dma.done.wait (%p3080_p9), [#allocation7], 16  }
  0x62   : > { %2034 = vsyncadd (%p3080_p9), [#allocation7], 4294967280  ;;  %v251_v0 = vld [vmem:[%s2246_s25 + $0x10] sm:$0xff]  ;;  %v2257_v1 = vld [vmem:[#allocation6] ss:$0 sm:$0xff]  ;;  %s378_s23 = sld [smem:[#allocation2]] }
  0x63   : > { %v249_v2 = vld [vmem:[%s2246_s25] sm:$0xff]  ;;  %v387_v3 = vmul.f32 %v2257_v1, %v251_v0  ;;  %v252_v5 = vld [vmem:[%s2246_s25 + $0x18] sm:$0xff]  ;;  %v250_v6 = vld [vmem:[%s2246_s25 + $0x8] sm:$0xff]  ;;  %vm1037_vm0 = vcmask 130112   ;;  %vm1044_vm1 = vcmask 195712   ;;  %vm1051_vm2 = vcmask 261312  }
  0x64   : > { %v385_v4 = vmul.f32 %v2257_v1, %v249_v2  ;;  %v388_v7 = vmul.f32 %v2257_v1, %v252_v5  ;;  %v386_v8 = vmul.f32 %v2257_v1, %v250_v6  ;;  %v254_v9 = vld [vmem:[%s2246_s25 + $0x28] sm:$0xff]  ;;  %v253_v10 = vld [vmem:[%s2246_s25 + $0x20] sm:$0xff]  ;;  %v256_v13 = vld [vmem:[%s2246_s25 + $0x38] sm:$0xff]  ;;  %vm1058_vm3 = vcmask 326912   ;;  %s1833_s27 = sshll.u32 %s2242_s24, 3  ;;  %s1836_s28 = sshll.u32 %s2057_s18, 1 }
  0x65   : > { %517 = vadd.xlane.f32.xlu1 %v387_v3  ;;  %v390_v11 = vmul.f32 %v2257_v1, %v254_v9  ;;  %v389_v12 = vmul.f32 %v2257_v1, %v253_v10  ;;  %v255_v14 = vld [vmem:[%s2246_s25 + $0x30] sm:$0xff]  ;;  %v392_v15 = vmul.f32 %v2257_v1, %v256_v13  ;;  %v258_v17 = vld [vmem:[%s2246_s25 + $0x48] sm:$0xff]  ;;  %v257_v18 = vld [vmem:[%s2246_s25 + $0x40] sm:$0xff]  ;;  %vm1065_vm4 = vcmask 392512   ;;  %s1718_s18 = sadd.s32 %s2053_s17, %s1836_s28  ;;  %s246_s29 = scalar_lea.vmem [#allocation8], %s1833_s27 }
  0x66   : > { %513 = vadd.xlane.f32.xlu0 %v385_v4  ;;  %v391_v16 = vmul.f32 %v2257_v1, %v255_v14  ;;  %v394_v19 = vmul.f32 %v2257_v1, %v258_v17  ;;  %v393_v20 = vmul.f32 %v2257_v1, %v257_v18  ;;  %v260_v21 = vld [vmem:[%s2246_s25 + $0x58] sm:$0xff]  ;;  %v259_v22 = vld [vmem:[%s2246_s25 + $0x50] sm:$0xff]  ;;  %v262_v25 = vld [vmem:[%s2246_s25 + $0x68] sm:$0xff]  ;;  %vm1072_vm5 = vcmask 458112   ;;  %s1837_s17 = sshll.u32 %s1718_s18, 7  ;;  %s1722_s8 = sshll.u32 %s246_s29, 4  ;;  %s3002_s8 = int_to_ptr.vmem [resolvable:$true] %s1722_s8 }
  0x67   : > { %v396_v23 = vmul.f32 %v2257_v1, %v260_v21  ;;  %v395_v24 = vmul.f32 %v2257_v1, %v259_v22  ;;  %v261_v26 = vld [vmem:[%s2246_s25 + $0x60] sm:$0xff]  ;;  %v398_v27 = vmul.f32 %v2257_v1, %v262_v25  ;;  %v264_v29 = vld [vmem:[%s2246_s25 + $0x78] sm:$0xff]  ;;  %v263_v30 = vld [vmem:[%s2246_s25 + $0x70] sm:$0xff]  ;;  %vm1079_vm6 = vcmask 523712   ;;  %s3000_s13 = scalar_lea.hbm %s3057_s3, %s1837_s17  ;;  %s1707_s26 = scalar_lea.sflag [#allocation5], %s2242_s24 }
  0x68   : > { %v397_v28 = vmul.f32 %v2257_v1, %v261_v26  ;;  %v400_v31 = vmul.f32 %v2257_v1, %v264_v29  ;;  %v399_v32 = vmul.f32 %v2257_v1, %v263_v30  ;;  %v266_v33 = vld [vmem:[%s2246_s25 + $0x88] sm:$0xff]  ;;  %v265_v34 = vld [vmem:[%s2246_s25 + $0x80] sm:$0xff]  ;;  %v268_v37 = vld [vmem:[%s2246_s25 + $0x98] sm:$0xff]  ;;  %vm1086_vm7 = vcmask 589312   ;;  %s1967_s11 = scalar_lea.vmem %s3002_s8, 128  ;;  %p3081_p2 = scmp.ne.s32.totalorder %s3072_s30, 0 }
  0x69   : > { %519 = vadd.xlane.f32.xlu1 %v388_v7  ;;  %v402_v35 = vmul.f32 %v2257_v1, %v266_v33  ;;  %v401_v36 = vmul.f32 %v2257_v1, %v265_v34  ;;  %v267_v38 = vld [vmem:[%s2246_s25 + $0x90] sm:$0xff]  ;;  %v404_v39 = vmul.f32 %v2257_v1, %v268_v37  ;;  %v270_v41 = vld [vmem:[%s2246_s25 + $0xa8] sm:$0xff]  ;;  %v269_v42 = vld [vmem:[%s2246_s25 + $0xa0] sm:$0xff]  ;;  %vm1093_vm8 = vcmask 654912   ;;  %p1968_p13 = scmp.ne.s32.totalorder %s3002_s8, %s1967_s11  ;;  %s2078_s4 = smov [#allocation8]  }
  0x6a   : > { %515 = vadd.xlane.f32.xlu0 %v386_v8  ;;  %v403_v40 = vmul.f32 %v2257_v1, %v267_v38  ;;  %v406_v43 = vmul.f32 %v2257_v1, %v270_v41  ;;  %v405_v44 = vmul.f32 %v2257_v1, %v269_v42  ;;  %v272_v45 = vld [vmem:[%s2246_s25 + $0xb8] sm:$0xff]  ;;  %v271_v46 = vld [vmem:[%s2246_s25 + $0xb0] sm:$0xff]  ;;  %v274_v49 = vld [vmem:[%s2246_s25 + $0xc8] sm:$0xff]  ;;  %vm1100_vm9 = vcmask 720512   ;;  %s1971_s9 = sshll.u32 %s2078_s4, 4  ;;  %s1972_s9 = int_to_ptr.vmem [resolvable:$false] %s1971_s9 }
  0x6b   : > { %v408_v47 = vmul.f32 %v2257_v1, %v272_v45  ;;  %v407_v48 = vmul.f32 %v2257_v1, %v271_v46  ;;  %v273_v50 = vld [vmem:[%s2246_s25 + $0xc0] sm:$0xff]  ;;  %v410_v51 = vmul.f32 %v2257_v1, %v274_v49  ;;  %v276_v53 = vld [vmem:[%s2246_s25 + $0xd8] sm:$0xff]  ;;  %v275_v54 = vld [vmem:[%s2246_s25 + $0xd0] sm:$0xff]  ;;  %vm1107_vm10 = vcmask 786112   ;;  %p1969_p4 = pnand %p1968_p13, %p3081_p2  ;;  %s1973_s12 = scalar_lea.vmem %s1972_s9, 256 }
  0x6c   : > { %v409_v52 = vmul.f32 %v2257_v1, %v273_v50  ;;  %v412_v55 = vmul.f32 %v2257_v1, %v276_v53  ;;  %v411_v56 = vmul.f32 %v2257_v1, %v275_v54  ;;  %v278_v57 = vld [vmem:[%s2246_s25 + $0xe8] sm:$0xff]  ;;  %v277_v58 = vld [vmem:[%s2246_s25 + $0xe0] sm:$0xff]  ;;  %v280_v61 = vld [vmem:[%s2246_s25 + $0xf8] sm:$0xff]  ;;  %vm1114_vm11 = vcmask 851712   ;;  %p1974_p10 = scmp.lt.s32.totalorder %s3002_s8, %s1972_s9  ;;  %p1975_p11 = scmp.lt.s32.totalorder %s1973_s12, %s1967_s11 }
  0x6d   : > { %523 = vadd.xlane.f32.xlu1 %v390_v11  ;;  %v414_v59 = vmul.f32 %v2257_v1, %v278_v57  ;;  %v413_v60 = vmul.f32 %v2257_v1, %v277_v58  ;;  %v279_v62 = vld [vmem:[%s2246_s25 + $0xf0] sm:$0xff]  ;;  %v416_v63 = vmul.f32 %v2257_v1, %v280_v61  ;;  %v282_v2 = vld [vmem:[%s2246_s25 + $0x108] sm:$0xff]  ;;  %v281_v3 = vld [vmem:[%s2246_s25 + $0x100] sm:$0xff]  ;;  %vm1121_vm12 = vcmask 917312   ;;  %p1970_p7 = pneg %p1969_p4 }
  0x6e   : > { %521 = vadd.xlane.f32.xlu0 %v389_v12  ;;  %v415_v0 = vmul.f32 %v2257_v1, %v279_v62  ;;  %v418_v4 = vmul.f32 %v2257_v1, %v282_v2  ;;  %v417_v5 = vmul.f32 %v2257_v1, %v281_v3  ;;  %v284_v6 = vld [vmem:[%s2246_s25 + $0x118] sm:$0xff]  ;;  %v283_v7 = vld [vmem:[%s2246_s25 + $0x110] sm:$0xff]  ;;  %v286_v10 = vld [vmem:[%s2246_s25 + $0x128] sm:$0xff]  ;;  %vm1128_vm13 = vcmask 982912   ;;  %p1976_p12 = por %p1975_p11, %p1974_p10 }
  0x6f   : > { %v420_v8 = vmul.f32 %v2257_v1, %v284_v6  ;;  %v419_v9 = vmul.f32 %v2257_v1, %v283_v7  ;;  %v285_v11 = vld [vmem:[%s2246_s25 + $0x120] sm:$0xff]  ;;  %v422_v12 = vmul.f32 %v2257_v1, %v286_v10  ;;  %v288_v14 = vld [vmem:[%s2246_s25 + $0x138] sm:$0xff]  ;;  %v290_v18 = vld [vmem:[%s2246_s25 + $0x148] sm:$0xff]  ;;  %vm1135_vm14 = vcmask 1048512  }
  0x70   : > { %v421_v13 = vmul.f32 %v2257_v1, %v285_v11  ;;  %v292_v22 = vld [vmem:[%s2246_s25 + $0x158] sm:$0xff]  ;;  %v294_v26 = vld [vmem:[%s2246_s25 + $0x168] sm:$0xff]  ;;  %vm1690_vm15 = vcmask 1041409   ;;  %p1977_p0 = pnand %p1976_p12, %p1970_p7 }
  0x71   : > { %527 = vadd.xlane.f32.xlu1 %v392_v15  ;;  %v287_v15 = vld [vmem:[%s2246_s25 + $0x130] sm:$0xff]  ;;  %v296_v30 = vld [vmem:[%s2246_s25 + $0x178] sm:$0xff]  ;;  %v298_v34 = vld [vmem:[%s2246_s25 + $0x188] sm:$0xff] }
  0x72   : > { %525 = vadd.xlane.f32.xlu0 %v391_v16  ;;  %v424_v16 = vmul.f32 %v2257_v1, %v288_v14  ;;  %v423_v17 = vmul.f32 %v2257_v1, %v287_v15  ;;  %v300_v38 = vld [vmem:[%s2246_s25 + $0x198] sm:$0xff]  ;;  %v302_v42 = vld [vmem:[%s2246_s25 + $0x1a8] sm:$0xff] }
  0x73   : > { %v304_v46 = vld [vmem:[%s2246_s25 + $0x1b8] sm:$0xff]  ;;  %v306_v50 = vld [vmem:[%s2246_s25 + $0x1c8] sm:$0xff] }
  0x74   : > { %v308_v54 = vld [vmem:[%s2246_s25 + $0x1d8] sm:$0xff]  ;;  %v310_v58 = vld [vmem:[%s2246_s25 + $0x1e8] sm:$0xff] }
  0x75   : > { %531 = vadd.xlane.f32.xlu1 %v394_v19  ;;  %v289_v19 = vld [vmem:[%s2246_s25 + $0x140] sm:$0xff]  ;;  %v312_v62 = vld [vmem:[%s2246_s25 + $0x1f8] sm:$0xff]  ;;  %v314_v3 = vld [vmem:[%s2246_s25 + $0x208] sm:$0xff] }
  0x76   : > { %529 = vadd.xlane.f32.xlu0 %v393_v20  ;;  %v426_v20 = vmul.f32 %v2257_v1, %v290_v18  ;;  %v425_v21 = vmul.f32 %v2257_v1, %v289_v19  ;;  %v316_v7 = vld [vmem:[%s2246_s25 + $0x218] sm:$0xff]  ;;  %v318_v11 = vld [vmem:[%s2246_s25 + $0x228] sm:$0xff] }
  0x77   : > { %v320_v15 = vld [vmem:[%s2246_s25 + $0x238] sm:$0xff] }
  0x78   : > { %v456_v18 = vmul.f32 %v2257_v1, %v320_v15  ;;  %v329_v15 = vld [vmem:[%s2246_s25 + $0x280] sm:$0xff] }
  0x79   : > { %535 = vadd.xlane.f32.xlu1 %v396_v23  ;;  %v291_v23 = vld [vmem:[%s2246_s25 + $0x150] sm:$0xff] }
  0x7a   : > { %533 = vadd.xlane.f32.xlu0 %v395_v24  ;;  %v428_v24 = vmul.f32 %v2257_v1, %v292_v22  ;;  %v427_v25 = vmul.f32 %v2257_v1, %v291_v23  ;;  %v321_v22 = vld [vmem:[%s2246_s25 + $0x240] sm:$0xff] }
  0x7d   : > { %539 = vadd.xlane.f32.xlu1 %v398_v27  ;;  %v293_v27 = vld [vmem:[%s2246_s25 + $0x160] sm:$0xff] }
  0x7e   : > { %537 = vadd.xlane.f32.xlu0 %v397_v28  ;;  %v430_v28 = vmul.f32 %v2257_v1, %v294_v26  ;;  %v429_v29 = vmul.f32 %v2257_v1, %v293_v27  ;;  %v457_v27 = vmul.f32 %v2257_v1, %v321_v22 }
  0x81   : > { %543 = vadd.xlane.f32.xlu1 %v400_v31  ;;  %v295_v31 = vld [vmem:[%s2246_s25 + $0x170] sm:$0xff] }
  0x82   : > { %541 = vadd.xlane.f32.xlu0 %v399_v32  ;;  %v432_v32 = vmul.f32 %v2257_v1, %v296_v30  ;;  %v431_v33 = vmul.f32 %v2257_v1, %v295_v31 }
  0x85   : > { %547 = vadd.xlane.f32.xlu1 %v402_v35  ;;  %v297_v35 = vld [vmem:[%s2246_s25 + $0x180] sm:$0xff] }
  0x86   : > { %545 = vadd.xlane.f32.xlu0 %v401_v36  ;;  %v434_v36 = vmul.f32 %v2257_v1, %v298_v34  ;;  %v433_v37 = vmul.f32 %v2257_v1, %v297_v35 }
  0x89   : > { %551 = vadd.xlane.f32.xlu1 %v404_v39  ;;  %v299_v39 = vld [vmem:[%s2246_s25 + $0x190] sm:$0xff] }
  0x8a   : > { %549 = vadd.xlane.f32.xlu0 %v403_v40  ;;  %v436_v40 = vmul.f32 %v2257_v1, %v300_v38  ;;  %v435_v41 = vmul.f32 %v2257_v1, %v299_v39  ;;  %v326_v39 = vld [vmem:[%s2246_s25 + $0x268] sm:$0xff] }
  0x8d   : > { %555 = vadd.xlane.f32.xlu1 %v406_v43  ;;  %v301_v43 = vld [vmem:[%s2246_s25 + $0x1a0] sm:$0xff] }
  0x8e   : > { %553 = vadd.xlane.f32.xlu0 %v405_v44  ;;  %v438_v44 = vmul.f32 %v2257_v1, %v302_v42  ;;  %v437_v45 = vmul.f32 %v2257_v1, %v301_v43 }
  0x91   : > { %559 = vadd.xlane.f32.xlu1 %v408_v47  ;;  %v303_v47 = vld [vmem:[%s2246_s25 + $0x1b0] sm:$0xff] }
  0x92   : > { %557 = vadd.xlane.f32.xlu0 %v407_v48  ;;  %v440_v48 = vmul.f32 %v2257_v1, %v304_v46  ;;  %v439_v49 = vmul.f32 %v2257_v1, %v303_v47 }
  0x95   : > { %563 = vadd.xlane.f32.xlu1 %v410_v51  ;;  %v305_v51 = vld [vmem:[%s2246_s25 + $0x1c0] sm:$0xff] }
  0x96   : > { %561 = vadd.xlane.f32.xlu0 %v409_v52  ;;  %v442_v52 = vmul.f32 %v2257_v1, %v306_v50  ;;  %v441_v53 = vmul.f32 %v2257_v1, %v305_v51  ;;  %v462_v50 = vmul.f32 %v2257_v1, %v326_v39 }
  0x99   : > { %567 = vadd.xlane.f32.xlu1 %v412_v55  ;;  %v307_v55 = vld [vmem:[%s2246_s25 + $0x1d0] sm:$0xff] }
  0x9a   : > { %565 = vadd.xlane.f32.xlu0 %v411_v56  ;;  %v444_v56 = vmul.f32 %v2257_v1, %v308_v54  ;;  %v443_v57 = vmul.f32 %v2257_v1, %v307_v55 }
  0x9d   : > { %571 = vadd.xlane.f32.xlu1 %v414_v59  ;;  %v309_v59 = vld [vmem:[%s2246_s25 + $0x1e0] sm:$0xff] }
  0x9e   : > { %569 = vadd.xlane.f32.xlu0 %v413_v60  ;;  %v446_v60 = vmul.f32 %v2257_v1, %v310_v58  ;;  %v445_v61 = vmul.f32 %v2257_v1, %v309_v59 }
  0xa1   : > { %575 = vadd.xlane.f32.xlu1 %v416_v63  ;;  %v311_v63 = vld [vmem:[%s2246_s25 + $0x1f0] sm:$0xff] }
  0xa2   : > { %573 = vadd.xlane.f32.xlu0 %v415_v0  ;;  %v448_v0 = vmul.f32 %v2257_v1, %v312_v62  ;;  %v447_v2 = vmul.f32 %v2257_v1, %v311_v63 }
  0xa5   : > { %579 = vadd.xlane.f32.xlu1 %v418_v4  ;;  %v313_v4 = vld [vmem:[%s2246_s25 + $0x200] sm:$0xff] }
  0xa6   : > { %577 = vadd.xlane.f32.xlu0 %v417_v5  ;;  %v450_v5 = vmul.f32 %v2257_v1, %v314_v3  ;;  %v449_v6 = vmul.f32 %v2257_v1, %v313_v4 }
  0xa9   : > { %583 = vadd.xlane.f32.xlu1 %v420_v8  ;;  %v315_v8 = vld [vmem:[%s2246_s25 + $0x210] sm:$0xff] }
  0xaa   : > { %581 = vadd.xlane.f32.xlu0 %v419_v9  ;;  %v452_v9 = vmul.f32 %v2257_v1, %v316_v7  ;;  %v451_v10 = vmul.f32 %v2257_v1, %v315_v8 }
  0xad   : > { %587 = vadd.xlane.f32.xlu1 %v422_v12  ;;  %v317_v12 = vld [vmem:[%s2246_s25 + $0x220] sm:$0xff] }
  0xae   : > { %585 = vadd.xlane.f32.xlu0 %v421_v13  ;;  %v454_v13 = vmul.f32 %v2257_v1, %v318_v11  ;;  %v453_v14 = vmul.f32 %v2257_v1, %v317_v12 }
  0xb1   : > { %591 = vadd.xlane.f32.xlu1 %v424_v16  ;;  %v319_v16 = vld [vmem:[%s2246_s25 + $0x230] sm:$0xff] }
  0xb2   : > { %589 = vadd.xlane.f32.xlu0 %v423_v17  ;;  %v1026_v17 = vlaneseq  ;;  %v455_v19 = vmul.f32 %v2257_v1, %v319_v16 }
  0xb4   : > { %v2406_v23 = vshrl.u32 %v1026_v17, 7 }
  0xb5   : > { %595 = vadd.xlane.f32.xlu1 %v426_v20  ;;  %v2402_v20 = vand.u32 127, %v1026_v17 }
  0xb6   : > { %593 = vadd.xlane.f32.xlu0 %v425_v21  ;;  %v322_v21 = vld [vmem:[%s2246_s25 + $0x248] sm:$0xff] }
  0xb7   : > { %v458_v26 = vmul.f32 %v2257_v1, %v322_v21  ;;  %v2419_v34 = vsub.s32 %v2402_v20, %v2406_v23  ;;  %v1053_v38 = vadd.s32 4294967264, %v2402_v20  ;;  %v1074_v55 = vadd.s32 4294967240, %v2402_v20 }
  0xb9   : > { %599 = vadd.xlane.f32.xlu1 %v428_v24  ;;  %v1046_v24 = vadd.s32 4294967272, %v2402_v20  ;;  %v2447_v54 = vsub.s32 %v1053_v38, %v2406_v23  ;;  %v2463_v7 = vsub.s32 %v1074_v55, %v2406_v23  ;;  %v332_v55 = vld [vmem:[%s2246_s25 + $0x298] sm:$0xff] }
  0xba   : > { %597 = vadd.xlane.f32.xlu0 %v427_v25  ;;  %v1032_v25 = vadd.s32 4294967288, %v2402_v20 }
  0xbb   : > { %v2422_v35 = vsub.s32 %v1046_v24, %v2406_v23 }
  0xbd   : > { %603 = vadd.xlane.f32.xlu1 %v430_v28  ;;  %v2412_v28 = vstv %s378_s23 }
  0xbe   : > { %601 = vadd.xlane.f32.xlu0 %v429_v29  ;;  %v1039_v29 = vadd.s32 4294967280, %v2402_v20 }
  0xc1   : > { %607 = vadd.xlane.f32.xlu1 %v432_v32  ;;  %v324_v32 = vld [vmem:[%s2246_s25 + $0x258] sm:$0xff] }
  0xc2   : > { %605 = vadd.xlane.f32.xlu0 %v431_v33  ;;  %v323_v33 = vld [vmem:[%s2246_s25 + $0x250] sm:$0xff]  ;;  %v460_v42 = vmul.f32 %v2257_v1, %v324_v32  ;;  %v1102_v32 = vadd.s32 4294967208, %v2402_v20 }
  0xc3   : > { %v459_v43 = vmul.f32 %v2257_v1, %v323_v33  ;;  %v345_v33 = vld [vmem:[%s2246_s25 + $0x300] sm:$0xff] }
  0xc5   : > { %611 = vadd.xlane.f32.xlu1 %v434_v36  ;;  %v2425_v36 = vsub.s32 %v1032_v25, %v2406_v23 }
  0xc6   : > { %609 = vadd.xlane.f32.xlu0 %v433_v37  ;;  %v1060_v37 = vadd.s32 4294967256, %v2402_v20 }
  0xc9   : > { %615 = vadd.xlane.f32.xlu1 %v436_v40  ;;  %v325_v40 = vld [vmem:[%s2246_s25 + $0x260] sm:$0xff] }
  0xca   : > { %613 = vadd.xlane.f32.xlu0 %v435_v41  ;;  %v461_v51 = vmul.f32 %v2257_v1, %v325_v40 }
  0xcd   : > { %619 = vadd.xlane.f32.xlu1 %v438_v44  ;;  %v2435_v44 = vsub.s32 %v1039_v29, %v2406_v23 }
  0xce   : > { %617 = vadd.xlane.f32.xlu0 %v437_v45 }
  0xd1   : > { %623 = vadd.xlane.f32.xlu1 %v440_v48 }
  0xd2   : > { %621 = vadd.xlane.f32.xlu0 %v439_v49 }
  0xd5   : > { %627 = vadd.xlane.f32.xlu1 %v442_v52  ;;  %v328_v52 = vld [vmem:[%s2246_s25 + $0x278] sm:$0xff] }
  0xd6   : > { %625 = vadd.xlane.f32.xlu0 %v441_v53  ;;  %v2444_v53 = vsub.s32 %v1060_v37, %v2406_v23  ;;  %v331_v37 = vld [vmem:[%s2246_s25 + $0x290] sm:$0xff] }
  0xd9   : > { %631 = vadd.xlane.f32.xlu1 %v444_v56  ;;  %v1067_v56 = vadd.s32 4294967248, %v2402_v20 }
  0xda   : > { %629 = vadd.xlane.f32.xlu0 %v443_v57 }
  0xdb   : > { %v2466_v8 = vsub.s32 %v1067_v56, %v2406_v23  ;;  %v346_v56 = vld [vmem:[%s2246_s25 + $0x308] sm:$0xff] }
  0xdd   : > { %635 = vadd.xlane.f32.xlu1 %v446_v60  ;;  %v327_v60 = vld [vmem:[%s2246_s25 + $0x270] sm:$0xff] }
  0xde   : > { %633 = vadd.xlane.f32.xlu0 %v445_v61 }
  0xe1   : > { %639 = vadd.xlane.f32.xlu1 %v448_v0  ;;  %v464_v0 = vmul.f32 %v2257_v1, %v328_v52  ;;  %v1116_v52 = vadd.s32 4294967192, %v2402_v20 }
  0xe2   : > { %637 = vadd.xlane.f32.xlu0 %v447_v2 }
  0xe5   : > { %643 = vadd.xlane.f32.xlu1 %v450_v5  ;;  %v1081_v5 = vadd.s32 4294967232, %v2402_v20 }
  0xe6   : > { %641 = vadd.xlane.f32.xlu0 %v449_v6 }
  0xe7   : > { %v2479_v22 = vsub.s32 %v1081_v5, %v2406_v23 }
  0xe9   : > { %647 = vadd.xlane.f32.xlu1 %v452_v9  ;;  %v463_v9 = vmul.f32 %v2257_v1, %v327_v60 }
  0xea   : > { %645 = vadd.xlane.f32.xlu0 %v451_v10 }
  0xed   : > { %651 = vadd.xlane.f32.xlu1 %v454_v13  ;;  %v1088_v13 = vadd.s32 4294967224, %v2402_v20 }
  0xee   : > { %649 = vadd.xlane.f32.xlu0 %v453_v14  ;;  %v330_v14 = vld [vmem:[%s2246_s25 + $0x288] sm:$0xff] }
  0xef   : > { %v466_v25 = vmul.f32 %v2257_v1, %v330_v14 }
  0xf1   : > { %655 = vadd.xlane.f32.xlu1 %v456_v18 }
  0xf2   : > { %653 = vadd.xlane.f32.xlu0 %v455_v19  ;;  %v518_v30 = vpop.xlane.xlu1 %517 }
  0xf3   : > { %v514_v31 = vpop.xlane.xlu0 %513  ;;  %v772_v45 = vadd.f32 %v2412_v28, %v518_v30 }
  0xf4   : > { %v770_v41 = vadd.f32 %v2412_v28, %v514_v31  ;;  %v2488_v31 = vsub.s32 %v1088_v13, %v2406_v23 }
  0xf5   : > { %659 = vadd.xlane.f32.xlu1 %v458_v26  ;;  %v1043_v61 = vrot.slane %v772_v45, %v2435_v44  ;;  %v465_v26 = vmul.f32 %v2257_v1, %v329_v15 }
  0xf6   : > { %657 = vadd.xlane.f32.xlu0 %v457_v27  ;;  %v520_v46 = vpop.xlane.xlu1 %519  ;;  %v1031_v57 = vrot.slane %v770_v41, %v2419_v34  ;;  %v1095_v27 = vadd.s32 4294967216, %v2402_v20 }
  0xf7   : > { %v516_v47 = vpop.xlane.xlu0 %515  ;;  %v773_v48 = vadd.f32 %v2412_v28, %v520_v46 }
  0xf8   : > { %v771_v49 = vadd.f32 %v2412_v28, %v516_v47  ;;  %v2499_v46 = vsub.s32 %v1095_v27, %v2406_v23  ;;  %v481_v47 = vmul.f32 %v2257_v1, %v345_v33 }
  0xf9   : > { %v1050_v58 = vrot.slane %v773_v48, %v2422_v35  ;;  %663 = vadd.xlane.f32.xlu1 %v460_v42  ;;  %v467_v48 = vmul.f32 %v2257_v1, %v331_v37 }
  0xfa   : > { %v1036_v59 = vrot.slane %v771_v49, %v2425_v36  ;;  %661 = vadd.xlane.f32.xlu0 %v459_v43  ;;  %v524_v62 = vpop.xlane.xlu1 %523  ;;  %v1109_v43 = vadd.s32 4294967200, %v2402_v20 }
  0xfb   : > { %v522_v63 = vpop.xlane.xlu0 %521  ;;  %v775_v3 = vadd.f32 %v2412_v28, %v524_v62 }
  0xfc   : > { %v1038_v2 = vsel %vm1037_vm0, %v1036_v59, %v1031_v57  ;;  %v774_v4 = vadd.f32 %v2412_v28, %v522_v63  ;;  %v2515_v62 = vsub.s32 %v1109_v43, %v2406_v23 }
  0xfd   : > { %v1045_v6 = vsel %vm1044_vm1, %v1043_v61, %v1038_v2  ;;  %v1064_v10 = vrot.slane %v775_v3, %v2444_v53  ;;  %667 = vadd.xlane.f32.xlu1 %v462_v50  ;;  %v482_v2 = vmul.f32 %v2257_v1, %v346_v56  ;;  %v1123_v3 = vadd.s32 4294967184, %v2402_v20 }
  0xfe   : > { %v1052_v11 = vsel %vm1051_vm2, %v1050_v58, %v1045_v6  ;;  %v1057_v12 = vrot.slane %v774_v4, %v2447_v54  ;;  %665 = vadd.xlane.f32.xlu0 %v461_v51  ;;  %v528_v16 = vpop.xlane.xlu1 %527  ;;  %v2506_v51 = vsub.s32 %v1102_v32, %v2406_v23  ;;  %v2524_v6 = vsub.s32 %v1116_v52, %v2406_v23 }
  0xff   : > { %v526_v17 = vpop.xlane.xlu0 %525  ;;  %v777_v19 = vadd.f32 %v2412_v28, %v528_v16 }
 0x100   : > { %v1059_v18 = vsel %vm1058_vm3, %v1057_v12, %v1052_v11  ;;  %v776_v21 = vadd.f32 %v2412_v28, %v526_v17  ;;  %v347_v11 = vld [vmem:[%s2246_s25 + $0x310] sm:$0xff] }
 0x101   : > { %v1066_v24 = vsel %vm1065_vm4, %v1064_v10, %v1059_v18  ;;  %v1078_v29 = vrot.slane %v777_v19, %v2463_v7  ;;  %671 = vadd.xlane.f32.xlu1 %v464_v0  ;;  %v468_v0 = vmul.f32 %v2257_v1, %v332_v55  ;;  %v361_v10 = vld [vmem:[%s2246_s25 + $0x380] sm:$0xff]  ;;  %v2534_v18 = vsub.s32 %v1123_v3, %v2406_v23 }
 0x102   : > { %v1071_v30 = vrot.slane %v776_v21, %v2466_v8  ;;  %669 = vadd.xlane.f32.xlu0 %v463_v9  ;;  %v532_v38 = vpop.xlane.xlu1 %531  ;;  %v1130_v9 = vadd.s32 4294967176, %v2402_v20  ;;  %v497_v20 = vmul.f32 %v2257_v1, %v361_v10  ;;  %v483_v19 = vmul.f32 %v2257_v1, %v347_v11  ;;  %v335_v11 = vld [vmem:[%s2246_s25 + $0x2b0] sm:$0xff] }
 0x103   : > { %v530_v39 = vpop.xlane.xlu0 %529  ;;  %v779_v41 = vadd.f32 %v2412_v28, %v532_v38 }
 0x104   : > { %v1073_v40 = vsel %vm1072_vm5, %v1071_v30, %v1066_v24  ;;  %v778_v42 = vadd.f32 %v2412_v28, %v530_v39  ;;  %v362_v30 = vld [vmem:[%s2246_s25 + $0x388] sm:$0xff] }
 0x105   : > { %v1080_v45 = vsel %vm1079_vm6, %v1078_v29, %v1073_v40  ;;  %v1092_v49 = vrot.slane %v779_v41, %v2488_v31  ;;  %675 = vadd.xlane.f32.xlu1 %v466_v25  ;;  %v2541_v25 = vsub.s32 %v1130_v9, %v2406_v23  ;;  %v498_v41 = vmul.f32 %v2257_v1, %v362_v30 }
 0x106   : > { %v1085_v50 = vrot.slane %v778_v42, %v2479_v22  ;;  %673 = vadd.xlane.f32.xlu0 %v465_v26  ;;  %v536_v57 = vpop.xlane.xlu1 %535  ;;  %v333_v26 = vld [vmem:[%s2246_s25 + $0x2a0] sm:$0xff]  ;;  %v363_v42 = vld [vmem:[%s2246_s25 + $0x390] sm:$0xff] }
 0x107   : > { %v534_v58 = vpop.xlane.xlu0 %533  ;;  %v781_v60 = vadd.f32 %v2412_v28, %v536_v57  ;;  %v469_v39 = vmul.f32 %v2257_v1, %v333_v26  ;;  %v499_v55 = vmul.f32 %v2257_v1, %v363_v42 }
 0x108   : > { %v1087_v59 = vsel %vm1086_vm7, %v1085_v50, %v1080_v45  ;;  %v780_v61 = vadd.f32 %v2412_v28, %v534_v58 }
 0x109   : > { %v1094_v63 = vsel %vm1093_vm8, %v1092_v49, %v1087_v59  ;;  %v1106_v4 = vrot.slane %v781_v60, %v2506_v51  ;;  %705 = vadd.xlane.f32.xlu1 %v481_v47  ;;  %v348_v47 = vld [vmem:[%s2246_s25 + $0x318] sm:$0xff]  ;;  %v349_v59 = vld [vmem:[%s2246_s25 + $0x320] sm:$0xff] }
 0x10a   : > { %v1099_v5 = vrot.slane %v780_v61, %v2499_v46  ;;  %677 = vadd.xlane.f32.xlu0 %v467_v48  ;;  %v540_v12 = vpop.xlane.xlu1 %539  ;;  %v484_v58 = vmul.f32 %v2257_v1, %v348_v47 }
 0x10b   : > { %v538_v13 = vpop.xlane.xlu0 %537  ;;  %v783_v15 = vadd.f32 %v2412_v28, %v540_v12 }
 0x10c   : > { %v1101_v14 = vsel %vm1100_vm9, %v1099_v5, %v1094_v63  ;;  %v782_v16 = vadd.f32 %v2412_v28, %v538_v13  ;;  %v334_v63 = vld [vmem:[%s2246_s25 + $0x2a8] sm:$0xff] }
 0x10d   : > { %v1108_v17 = vsel %vm1107_vm10, %v1106_v4, %v1101_v14  ;;  %v1120_v21 = vrot.slane %v783_v15, %v2524_v6  ;;  %679 = vadd.xlane.f32.xlu1 %v468_v0  ;;  %v485_v4 = vmul.f32 %v2257_v1, %v349_v59  ;;  %v470_v10 = vmul.f32 %v2257_v1, %v334_v63  ;;  %v364_v14 = vld [vmem:[%s2246_s25 + $0x398] sm:$0xff] }
 0x10e   : > { %v1113_v24 = vrot.slane %v782_v16, %v2515_v62  ;;  %707 = vadd.xlane.f32.xlu0 %v482_v2  ;;  %v544_v27 = vpop.xlane.xlu1 %543  ;;  %v500_v26 = vmul.f32 %v2257_v1, %v364_v14  ;;  %v367_v14 = vld [vmem:[%s2246_s25 + $0x3b0] sm:$0xff] }
 0x10f   : > { %v542_v29 = vpop.xlane.xlu0 %541  ;;  %v785_v33 = vadd.f32 %v2412_v28, %v544_v27  ;;  %v365_v27 = vld [vmem:[%s2246_s25 + $0x3a0] sm:$0xff] }
 0x110   : > { %v1115_v32 = vsel %vm1114_vm11, %v1113_v24, %v1108_v17  ;;  %v784_v37 = vadd.f32 %v2412_v28, %v542_v29 }
 0x111   : > { %v1122_v38 = vsel %vm1121_vm12, %v1120_v21, %v1115_v32  ;;  %v1134_v23 = vrot.slane %v785_v33, %v2541_v25  ;;  %737 = vadd.xlane.f32.xlu1 %v497_v20  ;;  %v350_v32 = vld [vmem:[%s2246_s25 + $0x328] sm:$0xff] }
 0x112   : > { %v1127_v40 = vrot.slane %v784_v37, %v2534_v18  ;;  %709 = vadd.xlane.f32.xlu0 %v483_v19  ;;  %v548_v43 = vpop.xlane.xlu1 %547  ;;  %v471_v19 = vmul.f32 %v2257_v1, %v335_v11  ;;  %v486_v42 = vmul.f32 %v2257_v1, %v350_v32  ;;  %v353_v32 = vld [vmem:[%s2246_s25 + $0x340] sm:$0xff] }
 0x113   : > { %v546_v45 = vpop.xlane.xlu0 %545  ;;  %v787_v49 = vadd.f32 %v2412_v28, %v548_v43  ;;  %v351_v43 = vld [vmem:[%s2246_s25 + $0x330] sm:$0xff] }
 0x114   : > { %v1129_v48 = vsel %vm1128_vm13, %v1127_v40, %v1122_v38  ;;  %v786_v50 = vadd.f32 %v2412_v28, %v546_v45 }
 0x115   : > { %v2559_v52 = vsel %vm1135_vm14, %v1134_v23, %v1129_v48  ;;  %v1144_v56 = vrot.slane %v787_v49, %v2425_v36  ;;  %681 = vadd.xlane.f32.xlu1 %v469_v39  ;;  %v501_v23 = vmul.f32 %v2257_v1, %v365_v27  ;;  %v336_v48 = vld [vmem:[%s2246_s25 + $0x2b8] sm:$0xff] }
 0x116   : > { %v1140_v57 = vrot.slane %v786_v50, %v2419_v34  ;;  %739 = vadd.xlane.f32.xlu0 %v498_v41  ;;  %v552_v60 = vpop.xlane.xlu1 %551 }
 0x117   : > { %v550_v61 = vpop.xlane.xlu0 %549  ;;  %v789_v2 = vadd.f32 %v2412_v28, %v552_v60  ;;  %v472_v60 = vmul.f32 %v2257_v1, %v336_v48  ;;  %v339_v48 = vld [vmem:[%s2246_s25 + $0x2d0] sm:$0xff] }
 0x118   : > { %v1145_v0 = vsel %vm1037_vm0, %v1144_v56, %v1140_v57  ;;  %v788_v3 = vadd.f32 %v2412_v28, %v550_v61  ;;  %v487_v57 = vmul.f32 %v2257_v1, %v351_v43  ;;  %v337_v61 = vld [vmem:[%s2246_s25 + $0x2c0] sm:$0xff] }
 0x119   : > { %v1154_v5 = vrot.slane %v789_v2, %v2422_v35  ;;  %741 = vadd.xlane.f32.xlu1 %v499_v55  ;;  %v366_v2 = vld [vmem:[%s2246_s25 + $0x3a8] sm:$0xff] }
 0x11a   : > { %v1149_v9 = vrot.slane %v788_v3, %v2435_v44  ;;  %711 = vadd.xlane.f32.xlu0 %v484_v58  ;;  %v556_v12 = vpop.xlane.xlu1 %555 }
 0x11b   : > { %v554_v13 = vpop.xlane.xlu0 %553  ;;  %v791_v16 = vadd.f32 %v2412_v28, %v556_v12 }
 0x11c   : > { %v1150_v15 = vsel %vm1044_vm1, %v1149_v9, %v1145_v0  ;;  %v790_v17 = vadd.f32 %v2412_v28, %v554_v13  ;;  %v502_v13 = vmul.f32 %v2257_v1, %v366_v2 }
 0x11d   : > { %v1155_v20 = vsel %vm1051_vm2, %v1154_v5, %v1150_v15  ;;  %v1164_v21 = vrot.slane %v791_v16, %v2444_v53  ;;  %713 = vadd.xlane.f32.xlu1 %v485_v4 }
 0x11e   : > { %v1159_v24 = vrot.slane %v790_v17, %v2447_v54  ;;  %683 = vadd.xlane.f32.xlu0 %v470_v10  ;;  %v560_v29 = vpop.xlane.xlu1 %559  ;;  %v473_v10 = vmul.f32 %v2257_v1, %v337_v61  ;;  %v352_v17 = vld [vmem:[%s2246_s25 + $0x338] sm:$0xff] }
 0x11f   : > { %v558_v30 = vpop.xlane.xlu0 %557  ;;  %v793_v37 = vadd.f32 %v2412_v28, %v560_v29 }
 0x120   : > { %v1160_v33 = vsel %vm1058_vm3, %v1159_v24, %v1155_v20  ;;  %v792_v38 = vadd.f32 %v2412_v28, %v558_v30  ;;  %v488_v30 = vmul.f32 %v2257_v1, %v352_v17 }
 0x121   : > { %v1165_v39 = vsel %vm1065_vm4, %v1164_v21, %v1160_v33  ;;  %v1174_v40 = vrot.slane %v793_v37, %v2463_v7  ;;  %685 = vadd.xlane.f32.xlu1 %v471_v19 }
 0x122   : > { %v1169_v41 = vrot.slane %v792_v38, %v2466_v8  ;;  %743 = vadd.xlane.f32.xlu0 %v500_v26  ;;  %v564_v45 = vpop.xlane.xlu1 %563  ;;  %v503_v26 = vmul.f32 %v2257_v1, %v367_v14  ;;  %v338_v38 = vld [vmem:[%s2246_s25 + $0x2c8] sm:$0xff] }
 0x123   : > { %v562_v47 = vpop.xlane.xlu0 %561  ;;  %v795_v50 = vadd.f32 %v2412_v28, %v564_v45 }
 0x124   : > { %v1170_v49 = vsel %vm1072_vm5, %v1169_v41, %v1165_v39  ;;  %v794_v55 = vadd.f32 %v2412_v28, %v562_v47  ;;  %v474_v47 = vmul.f32 %v2257_v1, %v338_v38 }
 0x125   : > { %v1175_v56 = vsel %vm1079_vm6, %v1174_v40, %v1170_v49  ;;  %v1184_v58 = vrot.slane %v795_v50, %v2488_v31  ;;  %745 = vadd.xlane.f32.xlu1 %v501_v23  ;;  %v368_v49 = vld [vmem:[%s2246_s25 + $0x3b8] sm:$0xff] }
 0x126   : > { %v1179_v59 = vrot.slane %v794_v55, %v2479_v22  ;;  %715 = vadd.xlane.f32.xlu0 %v486_v42  ;;  %v568_v63 = vpop.xlane.xlu1 %567  ;;  %v489_v42 = vmul.f32 %v2257_v1, %v353_v32  ;;  %v504_v61 = vmul.f32 %v2257_v1, %v368_v49 }
 0x127   : > { %v566_v0 = vpop.xlane.xlu0 %565  ;;  %v797_v4 = vadd.f32 %v2412_v28, %v568_v63 }
 0x128   : > { %v1180_v3 = vsel %vm1086_vm7, %v1179_v59, %v1175_v56  ;;  %v796_v5 = vadd.f32 %v2412_v28, %v566_v0 }
 0x129   : > { %v1185_v9 = vsel %vm1093_vm8, %v1184_v58, %v1180_v3  ;;  %v1194_v11 = vrot.slane %v797_v4, %v2506_v51  ;;  %717 = vadd.xlane.f32.xlu1 %v487_v57  ;;  %v369_v3 = vld [vmem:[%s2246_s25 + $0x3c0] sm:$0xff] }
 0x12a   : > { %v1189_v12 = vrot.slane %v796_v5, %v2499_v46  ;;  %687 = vadd.xlane.f32.xlu0 %v472_v60  ;;  %v572_v15 = vpop.xlane.xlu1 %571  ;;  %v475_v60 = vmul.f32 %v2257_v1, %v339_v48 }
 0x12b   : > { %v570_v16 = vpop.xlane.xlu0 %569  ;;  %v799_v19 = vadd.f32 %v2412_v28, %v572_v15 }
 0x12c   : > { %v1190_v20 = vsel %vm1100_vm9, %v1189_v12, %v1185_v9  ;;  %v798_v21 = vadd.f32 %v2412_v28, %v570_v16  ;;  %v354_v9 = vld [vmem:[%s2246_s25 + $0x348] sm:$0xff]  ;;  %v355_v16 = vld [vmem:[%s2246_s25 + $0x350] sm:$0xff] }
 0x12d   : > { %v1195_v24 = vsel %vm1107_vm10, %v1194_v11, %v1190_v20  ;;  %v1204_v27 = vrot.slane %v799_v19, %v2524_v6  ;;  %689 = vadd.xlane.f32.xlu1 %v473_v10  ;;  %v340_v19 = vld [vmem:[%s2246_s25 + $0x2d8] sm:$0xff] }
 0x12e   : > { %v1199_v29 = vrot.slane %v798_v21, %v2515_v62  ;;  %747 = vadd.xlane.f32.xlu0 %v502_v13  ;;  %v576_v33 = vpop.xlane.xlu1 %575 }
 0x12f   : > { %v574_v37 = vpop.xlane.xlu0 %573  ;;  %v801_v23 = vadd.f32 %v2412_v28, %v576_v33 }
 0x130   : > { %v1200_v39 = vsel %vm1114_vm11, %v1199_v29, %v1195_v24  ;;  %v800_v40 = vadd.f32 %v2412_v28, %v574_v37  ;;  %v341_v37 = vld [vmem:[%s2246_s25 + $0x2e0] sm:$0xff] }
 0x131   : > { %v1205_v41 = vsel %vm1121_vm12, %v1204_v27, %v1200_v39  ;;  %v1214_v43 = vrot.slane %v801_v23, %v2541_v25  ;;  %749 = vadd.xlane.f32.xlu1 %v503_v26  ;;  %v370_v23 = vld [vmem:[%s2246_s25 + $0x3c8] sm:$0xff] }
 0x132   : > { %v1209_v45 = vrot.slane %v800_v40, %v2534_v18  ;;  %719 = vadd.xlane.f32.xlu0 %v488_v30  ;;  %v580_v50 = vpop.xlane.xlu1 %579 }
 0x133   : > { %v578_v55 = vpop.xlane.xlu0 %577  ;;  %v803_v57 = vadd.f32 %v2412_v28, %v580_v50  ;;  %v371_v50 = vld [vmem:[%s2246_s25 + $0x3d0] sm:$0xff] }
 0x134   : > { %v1210_v56 = vsel %vm1128_vm13, %v1209_v45, %v1205_v41  ;;  %v802_v58 = vadd.f32 %v2412_v28, %v578_v55 }
 0x135   : > { %v1215_v59 = vsel %vm1135_vm14, %v1214_v43, %v1210_v56  ;;  %v1223_v0 = vrot.slane %v803_v57, %v2425_v36  ;;  %721 = vadd.xlane.f32.xlu1 %v489_v42  ;;  %v356_v57 = vld [vmem:[%s2246_s25 + $0x358] sm:$0xff] }
 0x136   : > { %v2643_v63 = vsel %vm1690_vm15, %v1215_v59, %v2559_v52  ;;  %v1219_v2 = vrot.slane %v802_v58, %v2419_v34  ;;  %691 = vadd.xlane.f32.xlu0 %v474_v47  ;;  %v584_v4 = vpop.xlane.xlu1 %583  ;;  %v2652_v52 = vld [vmem:[#allocation6] ss:$0 sm:$0xff]  ;;  %vm1692_vm15 = vcmask 1042434  }
 0x137   : > { %v582_v5 = vpop.xlane.xlu0 %581  ;;  %v805_v11 = vadd.f32 %v2412_v28, %v584_v4  ;;  %v505_v12 = vmul.f32 %v2652_v52, %v369_v3  ;;  %v490_v15 = vmul.f32 %v2652_v52, %v354_v9  ;;  %v491_v29 = vmul.f32 %v2652_v52, %v355_v16 }
 0x138   : > { %v1224_v10 = vsel %vm1037_vm0, %v1223_v0, %v1219_v2  ;;  %v804_v1 = vadd.f32 %v2412_v28, %v582_v5  ;;  %v476_v33 = vmul.f32 %v2652_v52, %v340_v19  ;;  %v477_v45 = vmul.f32 %v2652_v52, %v341_v37  ;;  %v357_v5 = vld [vmem:[%s2246_s25 + $0x360] sm:$0xff]  ;;  %v343_v19 = vld [vmem:[%s2246_s25 + $0x2f0] sm:$0xff] }
 0x139   : > { %v1233_v13 = vrot.slane %v805_v11, %v2422_v35  ;;  %693 = vadd.xlane.f32.xlu1 %v475_v60  ;;  %v506_v49 = vmul.f32 %v2652_v52, %v370_v23  ;;  %v507_v0 = vmul.f32 %v2652_v52, %v371_v50  ;;  %v492_v4 = vmul.f32 %v2652_v52, %v356_v57  ;;  %v342_v11 = vld [vmem:[%s2246_s25 + $0x2e8] sm:$0xff]  ;;  %v373_v23 = vld [vmem:[%s2246_s25 + $0x3e0] sm:$0xff]  ;;  %v359_v57 = vld [vmem:[%s2246_s25 + $0x370] sm:$0xff] }
 0x13a   : > { %v1228_v14 = vrot.slane %v804_v1, %v2435_v44  ;;  %751 = vadd.xlane.f32.xlu0 %v504_v61  ;;  %v588_v17 = vpop.xlane.xlu1 %587 }
 0x13b   : > { %v586_v20 = vpop.xlane.xlu0 %585  ;;  %v807_v24 = vadd.f32 %v2412_v28, %v588_v17 }
 0x13c   : > { %v1229_v21 = vsel %vm1044_vm1, %v1228_v14, %v1224_v10  ;;  %v806_v26 = vadd.f32 %v2412_v28, %v586_v20  ;;  %v478_v20 = vmul.f32 %v2652_v52, %v342_v11 }
 0x13d   : > { %v1234_v27 = vsel %vm1051_vm2, %v1233_v13, %v1229_v21  ;;  %v1243_v30 = vrot.slane %v807_v24, %v2444_v53  ;;  %753 = vadd.xlane.f32.xlu1 %v505_v12 }
 0x13e   : > { %v1238_v32 = vrot.slane %v806_v26, %v2447_v54  ;;  %723 = vadd.xlane.f32.xlu0 %v490_v15  ;;  %v592_v38 = vpop.xlane.xlu1 %591  ;;  %v493_v15 = vmul.f32 %v2652_v52, %v357_v5  ;;  %v372_v26 = vld [vmem:[%s2246_s25 + $0x3d8] sm:$0xff] }
 0x13f   : > { %v590_v39 = vpop.xlane.xlu0 %589  ;;  %v809_v41 = vadd.f32 %v2412_v28, %v592_v38 }
 0x140   : > { %v1239_v40 = vsel %vm1058_vm3, %v1238_v32, %v1234_v27  ;;  %v808_v42 = vadd.f32 %v2412_v28, %v590_v39  ;;  %v508_v39 = vmul.f32 %v2652_v52, %v372_v26 }
 0x141   : > { %v1244_v43 = vsel %vm1065_vm4, %v1243_v30, %v1239_v40  ;;  %v1253_v47 = vrot.slane %v809_v41, %v2463_v7  ;;  %725 = vadd.xlane.f32.xlu1 %v491_v29 }
 0x142   : > { %v1248_v48 = vrot.slane %v808_v42, %v2466_v8  ;;  %695 = vadd.xlane.f32.xlu0 %v476_v33  ;;  %v596_v55 = vpop.xlane.xlu1 %595  ;;  %v479_v33 = vmul.f32 %v2652_v52, %v343_v19  ;;  %v358_v42 = vld [vmem:[%s2246_s25 + $0x368] sm:$0xff] }
 0x143   : > { %v594_v56 = vpop.xlane.xlu0 %593  ;;  %v811_v59 = vadd.f32 %v2412_v28, %v596_v55 }
 0x144   : > { %v1249_v58 = vsel %vm1072_vm5, %v1248_v48, %v1244_v43  ;;  %v810_v60 = vadd.f32 %v2412_v28, %v594_v56  ;;  %v494_v56 = vmul.f32 %v2652_v52, %v358_v42 }
 0x145   : > { %v1254_v61 = vsel %vm1079_vm6, %v1253_v47, %v1249_v58  ;;  %v1263_v2 = vrot.slane %v811_v59, %v2488_v31  ;;  %697 = vadd.xlane.f32.xlu1 %v477_v45  ;;  %v344_v58 = vld [vmem:[%s2246_s25 + $0x2f8] sm:$0xff] }
 0x146   : > { %v1258_v3 = vrot.slane %v810_v60, %v2479_v22  ;;  %755 = vadd.xlane.f32.xlu0 %v506_v49  ;;  %v600_v9 = vpop.xlane.xlu1 %599  ;;  %v509_v49 = vmul.f32 %v2652_v52, %v373_v23  ;;  %v480_v5 = vmul.f32 %v2652_v52, %v344_v58 }
 0x147   : > { %v598_v10 = vpop.xlane.xlu0 %597  ;;  %v813_v12 = vadd.f32 %v2412_v28, %v600_v9 }
 0x148   : > { %v1259_v1 = vsel %vm1086_vm7, %v1258_v3, %v1254_v61  ;;  %v812_v13 = vadd.f32 %v2412_v28, %v598_v10 }
 0x149   : > { %v1264_v14 = vsel %vm1093_vm8, %v1263_v2, %v1259_v1  ;;  %v1273_v16 = vrot.slane %v813_v12, %v2506_v51  ;;  %757 = vadd.xlane.f32.xlu1 %v507_v0  ;;  %v360_v1 = vld [vmem:[%s2246_s25 + $0x378] sm:$0xff] }
 0x14a   : > { %v1268_v17 = vrot.slane %v812_v13, %v2499_v46  ;;  %727 = vadd.xlane.f32.xlu0 %v492_v4  ;;  %v604_v21 = vpop.xlane.xlu1 %603  ;;  %v495_v4 = vmul.f32 %v2652_v52, %v359_v57 }
 0x14b   : > { %v602_v24 = vpop.xlane.xlu0 %601  ;;  %v815_v29 = vadd.f32 %v2412_v28, %v604_v21 }
 0x14c   : > { %v1269_v27 = vsel %vm1100_vm9, %v1268_v17, %v1264_v14  ;;  %v814_v30 = vadd.f32 %v2412_v28, %v602_v24  ;;  %v374_v14 = vld [vmem:[%s2246_s25 + $0x3e8] sm:$0xff]  ;;  %v375_v24 = vld [vmem:[%s2246_s25 + $0x3f0] sm:$0xff] }
 0x14d   : > { %v1274_v32 = vsel %vm1107_vm10, %v1273_v16, %v1269_v27  ;;  %v1283_v37 = vrot.slane %v815_v29, %v2524_v6  ;;  %729 = vadd.xlane.f32.xlu1 %v493_v15  ;;  %v510_v21 = vmul.f32 %v2652_v52, %v374_v14  ;;  %v376_v29 = vld [vmem:[%s2246_s25 + $0x3f8] sm:$0xff] }
 0x14e   : > { %v1278_v38 = vrot.slane %v814_v30, %v2515_v62  ;;  %699 = vadd.xlane.f32.xlu0 %v478_v20  ;;  %v608_v40 = vpop.xlane.xlu1 %607 }
 0x14f   : > { %v606_v41 = vpop.xlane.xlu0 %605  ;;  %v817_v45 = vadd.f32 %v2412_v28, %v608_v40  ;;  %v512_v40 = vmul.f32 %v2652_v52, %v376_v29 }
 0x150   : > { %v1279_v43 = vsel %vm1114_vm11, %v1278_v38, %v1274_v32  ;;  %v816_v47 = vadd.f32 %v2412_v28, %v606_v41  ;;  %v511_v38 = vmul.f32 %v2652_v52, %v375_v24 }
 0x151   : > { %v1284_v48 = vsel %vm1121_vm12, %v1283_v37, %v1279_v43  ;;  %v1293_v50 = vrot.slane %v817_v45, %v2541_v25  ;;  %701 = vadd.xlane.f32.xlu1 %v479_v33 }
 0x152   : > { %v1288_v55 = vrot.slane %v816_v47, %v2534_v18  ;;  %759 = vadd.xlane.f32.xlu0 %v508_v39  ;;  %v612_v59 = vpop.xlane.xlu1 %611 }
 0x153   : > { %v610_v60 = vpop.xlane.xlu0 %609  ;;  %v819_v0 = vadd.f32 %v2412_v28, %v612_v59 }
 0x154   : > { %v1289_v61 = vsel %vm1128_vm13, %v1288_v55, %v1284_v48  ;;  %v818_v2 = vadd.f32 %v2412_v28, %v610_v60 }
 0x155   : > { %v1294_v3 = vsel %vm1135_vm14, %v1293_v50, %v1289_v61  ;;  %v1302_v10 = vrot.slane %v819_v0, %v2425_v36  ;;  %761 = vadd.xlane.f32.xlu1 %v509_v49 }
 0x156   : > { %v2727_v9 = vsel %vm1692_vm15, %v1294_v3, %v2643_v63  ;;  %v1298_v11 = vrot.slane %v818_v2, %v2419_v34  ;;  %731 = vadd.xlane.f32.xlu0 %v494_v56  ;;  %v616_v12 = vpop.xlane.xlu1 %615  ;;  %v496_v63 = vmul.f32 %v2652_v52, %v360_v1  ;;  %vm1694_vm15 = vcmask 1043459  }
 0x157   : > { %v614_v13 = vpop.xlane.xlu0 %613  ;;  %v821_v16 = vadd.f32 %v2412_v28, %v616_v12 }
 0x158   : > { %v1303_v15 = vsel %vm1037_vm0, %v1302_v10, %v1298_v11  ;;  %v820_v17 = vadd.f32 %v2412_v28, %v614_v13 }
 0x159   : > { %v1312_v20 = vrot.slane %v821_v16, %v2422_v35  ;;  %733 = vadd.xlane.f32.xlu1 %v495_v4 }
 0x15a   : > { %v1307_v19 = vrot.slane %v820_v17, %v2435_v44  ;;  %703 = vadd.xlane.f32.xlu0 %v480_v5  ;;  %v620_v26 = vpop.xlane.xlu1 %619 }
 0x15b   : > { %v618_v27 = vpop.xlane.xlu0 %617  ;;  %v823_v32 = vadd.f32 %v2412_v28, %v620_v26 }
 0x15c   : > { %v1308_v30 = vsel %vm1044_vm1, %v1307_v19, %v1303_v15  ;;  %v822_v33 = vadd.f32 %v2412_v28, %v618_v27 }
 0x15d   : > { %v1313_v37 = vsel %vm1051_vm2, %v1312_v20, %v1308_v30  ;;  %v1322_v39 = vrot.slane %v823_v32, %v2444_v53  ;;  %735 = vadd.xlane.f32.xlu1 %v496_v63 }
 0x15e   : > { %v1317_v23 = vrot.slane %v822_v33, %v2447_v54  ;;  %763 = vadd.xlane.f32.xlu0 %v510_v21  ;;  %v624_v41 = vpop.xlane.xlu1 %623 }
 0x15f   : > { %v622_v42 = vpop.xlane.xlu0 %621  ;;  %v825_v45 = vadd.f32 %v2412_v28, %v624_v41 }
 0x160   : > { %v1318_v43 = vsel %vm1058_vm3, %v1317_v23, %v1313_v37  ;;  %v824_v47 = vadd.f32 %v2412_v28, %v622_v42 }
 0x161   : > { %v1323_v48 = vsel %vm1065_vm4, %v1322_v39, %v1318_v43  ;;  %v1332_v49 = vrot.slane %v825_v45, %v2463_v7  ;;  %767 = vadd.xlane.f32.xlu1 %v512_v40 }
 0x162   : > { %v1327_v50 = vrot.slane %v824_v47, %v2466_v8  ;;  %765 = vadd.xlane.f32.xlu0 %v511_v38  ;;  %v628_v55 = vpop.xlane.xlu1 %627 }
 0x163   : > { %v626_v56 = vpop.xlane.xlu0 %625  ;;  %v827_v57 = vadd.f32 %v2412_v28, %v628_v55 }
 0x164   : > { %v1328_v52 = vsel %vm1072_vm5, %v1327_v50, %v1323_v48  ;;  %v826_v58 = vadd.f32 %v2412_v28, %v626_v56 }
 0x165   : > { %v1333_v59 = vsel %vm1079_vm6, %v1332_v49, %v1328_v52  ;;  %v1342_v60 = vrot.slane %v827_v57, %v2488_v31 }
 0x166   : > { %v1337_v61 = vrot.slane %v826_v58, %v2479_v22  ;;  %v632_v0 = vpop.xlane.xlu1 %631 }
 0x167   : > { %v630_v2 = vpop.xlane.xlu0 %629  ;;  %v829_v4 = vadd.f32 %v2412_v28, %v632_v0 }
 0x168   : > { %v1338_v3 = vsel %vm1086_vm7, %v1337_v61, %v1333_v59  ;;  %v828_v5 = vadd.f32 %v2412_v28, %v630_v2 }
 0x169   : > { %v1343_v10 = vsel %vm1093_vm8, %v1342_v60, %v1338_v3  ;;  %v1352_v11 = vrot.slane %v829_v4, %v2506_v51 }
 0x16a   : > { %v1347_v1 = vrot.slane %v828_v5, %v2499_v46  ;;  %v636_v12 = vpop.xlane.xlu1 %635 }
 0x16b   : > { %v634_v13 = vpop.xlane.xlu0 %633  ;;  %v831_v15 = vadd.f32 %v2412_v28, %v636_v12 }
 0x16c   : > { %v1348_v14 = vsel %vm1100_vm9, %v1347_v1, %v1343_v10  ;;  %v830_v16 = vadd.f32 %v2412_v28, %v634_v13 }
 0x16d   : > { %v1353_v17 = vsel %vm1107_vm10, %v1352_v11, %v1348_v14  ;;  %v1362_v63 = vrot.slane %v831_v15, %v2524_v6 }
 0x16e   : > { %v1357_v20 = vrot.slane %v830_v16, %v2515_v62  ;;  %v640_v19 = vpop.xlane.xlu1 %639 }
 0x16f   : > { %v638_v21 = vpop.xlane.xlu0 %637  ;;  %v833_v26 = vadd.f32 %v2412_v28, %v640_v19 }
 0x170   : > { %v1358_v24 = vsel %vm1114_vm11, %v1357_v20, %v1353_v17  ;;  %v832_v27 = vadd.f32 %v2412_v28, %v638_v21 }
 0x171   : > { %v1363_v29 = vsel %vm1121_vm12, %v1362_v63, %v1358_v24  ;;  %v1372_v30 = vrot.slane %v833_v26, %v2541_v25 }
 0x172   : > { %v1367_v32 = vrot.slane %v832_v27, %v2534_v18  ;;  %v644_v33 = vpop.xlane.xlu1 %643 }
 0x173   : > { %v642_v37 = vpop.xlane.xlu0 %641  ;;  %v835_v39 = vadd.f32 %v2412_v28, %v644_v33 }
 0x174   : > { %v1368_v38 = vsel %vm1128_vm13, %v1367_v32, %v1363_v29  ;;  %v834_v23 = vadd.f32 %v2412_v28, %v642_v37 }
 0x175   : > { %v1373_v40 = vsel %vm1135_vm14, %v1372_v30, %v1368_v38  ;;  %v1381_v42 = vrot.slane %v835_v39, %v2425_v36 }
 0x176   : > { %v2785_v41 = vsel %vm1694_vm15, %v1373_v40, %v2727_v9  ;;  %v1377_v43 = vrot.slane %v834_v23, %v2419_v34  ;;  %v648_v45 = vpop.xlane.xlu1 %647  ;;  %vm1696_vm15 = vcmask 1044484  }
 0x177   : > { %v646_v47 = vpop.xlane.xlu0 %645  ;;  %v837_v49 = vadd.f32 %v2412_v28, %v648_v45 }
 0x178   : > { %v1382_v48 = vsel %vm1037_vm0, %v1381_v42, %v1377_v43  ;;  %v836_v50 = vadd.f32 %v2412_v28, %v646_v47 }
 0x179   : > { %v1391_v55 = vrot.slane %v837_v49, %v2422_v35 }
 0x17a   : > { %v1386_v56 = vrot.slane %v836_v50, %v2435_v44  ;;  %v652_v52 = vpop.xlane.xlu1 %651 }
 0x17b   : > { %v650_v57 = vpop.xlane.xlu0 %649  ;;  %v839_v58 = vadd.f32 %v2412_v28, %v652_v52 }
 0x17c   : > { %v1387_v9 = vsel %vm1044_vm1, %v1386_v56, %v1382_v48  ;;  %v838_v59 = vadd.f32 %v2412_v28, %v650_v57 }
 0x17d   : > { %v1392_v60 = vsel %vm1051_vm2, %v1391_v55, %v1387_v9  ;;  %v1401_v61 = vrot.slane %v839_v58, %v2444_v53 }
 0x17e   : > { %v1396_v0 = vrot.slane %v838_v59, %v2447_v54  ;;  %v656_v2 = vpop.xlane.xlu1 %655 }
 0x17f   : > { %v654_v3 = vpop.xlane.xlu0 %653  ;;  %v841_v5 = vadd.f32 %v2412_v28, %v656_v2 }
 0x180   : > { %v1397_v4 = vsel %vm1058_vm3, %v1396_v0, %v1392_v60  ;;  %v840_v10 = vadd.f32 %v2412_v28, %v654_v3 }
 0x181   : > { %v1402_v11 = vsel %vm1065_vm4, %v1401_v61, %v1397_v4  ;;  %v1411_v1 = vrot.slane %v841_v5, %v2463_v7 }
 0x182   : > { %v1406_v12 = vrot.slane %v840_v10, %v2466_v8  ;;  %v660_v13 = vpop.xlane.xlu1 %659 }
 0x183   : > { %v658_v14 = vpop.xlane.xlu0 %657  ;;  %v843_v16 = vadd.f32 %v2412_v28, %v660_v13 }
 0x184   : > { %v1407_v15 = vsel %vm1072_vm5, %v1406_v12, %v1402_v11  ;;  %v842_v17 = vadd.f32 %v2412_v28, %v658_v14 }
 0x185   : > { %v1412_v63 = vsel %vm1079_vm6, %v1411_v1, %v1407_v15  ;;  %v1421_v20 = vrot.slane %v843_v16, %v2488_v31 }
 0x186   : > { %v1416_v19 = vrot.slane %v842_v17, %v2479_v22  ;;  %v664_v21 = vpop.xlane.xlu1 %663 }
 0x187   : > { %v662_v24 = vpop.xlane.xlu0 %661  ;;  %v845_v27 = vadd.f32 %v2412_v28, %v664_v21 }
 0x188   : > { %v1417_v26 = vsel %vm1086_vm7, %v1416_v19, %v1412_v63  ;;  %v844_v29 = vadd.f32 %v2412_v28, %v662_v24 }
 0x189   : > { %v1422_v30 = vsel %vm1093_vm8, %v1421_v20, %v1417_v26  ;;  %v1431_v32 = vrot.slane %v845_v27, %v2506_v51 }
 0x18a   : > { %v1426_v33 = vrot.slane %v844_v29, %v2499_v46  ;;  %v668_v37 = vpop.xlane.xlu1 %667 }
 0x18b   : > { %v666_v38 = vpop.xlane.xlu0 %665  ;;  %v847_v23 = vadd.f32 %v2412_v28, %v668_v37 }
 0x18c   : > { %v1427_v39 = vsel %vm1100_vm9, %v1426_v33, %v1422_v30  ;;  %v846_v40 = vadd.f32 %v2412_v28, %v666_v38 }
 0x18d   : > { %v1432_v42 = vsel %vm1107_vm10, %v1431_v32, %v1427_v39  ;;  %v1441_v43 = vrot.slane %v847_v23, %v2524_v6 }
 0x18e   : > { %v1436_v45 = vrot.slane %v846_v40, %v2515_v62  ;;  %v672_v47 = vpop.xlane.xlu1 %671 }
 0x18f   : > { %v670_v48 = vpop.xlane.xlu0 %669  ;;  %v849_v50 = vadd.f32 %v2412_v28, %v672_v47 }
 0x190   : > { %v1437_v49 = vsel %vm1114_vm11, %v1436_v45, %v1432_v42  ;;  %v848_v55 = vadd.f32 %v2412_v28, %v670_v48 }
 0x191   : > { %v1442_v56 = vsel %vm1121_vm12, %v1441_v43, %v1437_v49  ;;  %v1451_v52 = vrot.slane %v849_v50, %v2541_v25 }
 0x192   : > { %v1446_v57 = vrot.slane %v848_v55, %v2534_v18  ;;  %v676_v9 = vpop.xlane.xlu1 %675 }
 0x193   : > { %v674_v58 = vpop.xlane.xlu0 %673  ;;  %v851_v60 = vadd.f32 %v2412_v28, %v676_v9 }
 0x194   : > { %v1447_v59 = vsel %vm1128_vm13, %v1446_v57, %v1442_v56  ;;  %v850_v61 = vadd.f32 %v2412_v28, %v674_v58 }
 0x195   : > { %v1452_v0 = vsel %vm1135_vm14, %v1451_v52, %v1447_v59  ;;  %v1460_v2 = vrot.slane %v851_v60, %v2425_v36 }
 0x196   : > { %v1456_v3 = vrot.slane %v850_v61, %v2419_v34  ;;  %v2837_v4 = vsel %vm1696_vm15, %v1452_v0, %v2785_v41  ;;  %v706_v5 = vpop.xlane.xlu1 %705 }
 0x197   : > { %v678_v10 = vpop.xlane.xlu0 %677  ;;  %v866_v12 = vadd.f32 %v2412_v28, %v706_v5 }
 0x198   : > { %v1461_v11 = vsel %vm1037_vm0, %v1460_v2, %v1456_v3  ;;  %v852_v1 = vadd.f32 %v2412_v28, %v678_v10 }
 0x199   : > { %v1535_v41 = vrot.slane %v866_v12, %v2419_v34 }
 0x19a   : > { %v1465_v13 = vrot.slane %v852_v1, %v2435_v44  ;;  %v680_v14 = vpop.xlane.xlu1 %679 }
 0x19b   : > { %v708_v15 = vpop.xlane.xlu0 %707  ;;  %v853_v17 = vadd.f32 %v2412_v28, %v680_v14 }
 0x19c   : > { %v1466_v16 = vsel %vm1044_vm1, %v1465_v13, %v1461_v11  ;;  %v867_v63 = vadd.f32 %v2412_v28, %v708_v15 }
 0x19d   : > { %v1470_v20 = vrot.slane %v853_v17, %v2422_v35 }
 0x19e   : > { %v1539_v19 = vrot.slane %v867_v63, %v2425_v36  ;;  %v738_v21 = vpop.xlane.xlu1 %737 }
 0x19f   : > { %v710_v24 = vpop.xlane.xlu0 %709  ;;  %v1471_v26 = vsel %vm1051_vm2, %v1470_v20, %v1466_v16  ;;  %v882_v10 = vadd.f32 %v2412_v28, %v738_v21 }
 0x1a0   : > { %v1540_v27 = vsel %vm1037_vm0, %v1539_v19, %v1535_v41  ;;  %v868_v29 = vadd.f32 %v2412_v28, %v710_v24 }
 0x1a1   : > { %v1614_v20 = vrot.slane %v882_v10, %v2419_v34 }
 0x1a2   : > { %v1544_v30 = vrot.slane %v868_v29, %v2435_v44  ;;  %v682_v32 = vpop.xlane.xlu1 %681 }
 0x1a3   : > { %v740_v33 = vpop.xlane.xlu0 %739  ;;  %v854_v3 = vadd.f32 %v2412_v28, %v682_v32 }
 0x1a4   : > { %v1545_v37 = vsel %vm1044_vm1, %v1544_v30, %v1540_v27  ;;  %v883_v5 = vadd.f32 %v2412_v28, %v740_v33 }
 0x1a5   : > { %v1475_v14 = vrot.slane %v854_v3, %v2447_v54 }
 0x1a6   : > { %v742_v38 = vpop.xlane.xlu1 %741  ;;  %v1618_v15 = vrot.slane %v883_v5, %v2425_v36 }
 0x1a7   : > { %v712_v39 = vpop.xlane.xlu0 %711  ;;  %v884_v11 = vadd.f32 %v2412_v28, %v742_v38  ;;  %v1476_v32 = vsel %vm1058_vm3, %v1475_v14, %v1471_v26 }
 0x1a8   : > { %v869_v1 = vadd.f32 %v2412_v28, %v712_v39  ;;  %v1619_v33 = vsel %vm1037_vm0, %v1618_v15, %v1614_v20  ;;  %vm1698_vm0 = vcmask 1045509  }
 0x1a9   : > { %v1623_v19 = vrot.slane %v884_v11, %v2435_v44 }
 0x1aa   : > { %v714_v23 = vpop.xlane.xlu1 %713  ;;  %v1549_v27 = vrot.slane %v869_v1, %v2422_v35 }
 0x1ab   : > { %v684_v40 = vpop.xlane.xlu0 %683  ;;  %v870_v17 = vadd.f32 %v2412_v28, %v714_v23 }
 0x1ac   : > { %v855_v16 = vadd.f32 %v2412_v28, %v684_v40 }
 0x1ad   : > { %v1554_v44 = vrot.slane %v870_v17, %v2447_v54 }
 0x1ae   : > { %v686_v42 = vpop.xlane.xlu1 %685  ;;  %v1480_v38 = vrot.slane %v855_v16, %v2444_v53 }
 0x1af   : > { %v744_v43 = vpop.xlane.xlu0 %743  ;;  %v856_v63 = vadd.f32 %v2412_v28, %v686_v42  ;;  %v1624_v42 = vsel %vm1044_vm1, %v1623_v19, %v1619_v33  ;;  %vm1700_vm1 = vcmask 1046534  }
 0x1b0   : > { %v885_v41 = vadd.f32 %v2412_v28, %v744_v43 }
 0x1b1   : > { %v1485_v39 = vrot.slane %v856_v63, %v2466_v8 }
 0x1b2   : > { %v746_v45 = vpop.xlane.xlu1 %745  ;;  %v1628_v23 = vrot.slane %v885_v41, %v2422_v35 }
 0x1b3   : > { %v716_v47 = vpop.xlane.xlu0 %715  ;;  %v886_v21 = vadd.f32 %v2412_v28, %v746_v45 }
 0x1b4   : > { %v871_v24 = vadd.f32 %v2412_v28, %v716_v47  ;;  %v1550_v47 = vsel %vm1051_vm2, %v1549_v27, %v1545_v37  ;;  %v1629_v1 = vsel %vm1051_vm2, %v1628_v23, %v1624_v42  ;;  %vm1702_vm2 = vcmask 1047559  }
 0x1b5   : > { %v1633_v43 = vrot.slane %v886_v21, %v2447_v54 }
 0x1b6   : > { %v718_v48 = vpop.xlane.xlu1 %717  ;;  %v1559_v26 = vrot.slane %v871_v24, %v2444_v53 }
 0x1b7   : > { %v688_v49 = vpop.xlane.xlu0 %687  ;;  %v872_v36 = vadd.f32 %v2412_v28, %v718_v48 }
 0x1b8   : > { %v857_v34 = vadd.f32 %v2412_v28, %v688_v49 }
 0x1b9   : > { %v1564_v48 = vrot.slane %v872_v36, %v2466_v8 }
 0x1ba   : > { %v690_v50 = vpop.xlane.xlu1 %689  ;;  %v1490_v10 = vrot.slane %v857_v34, %v2463_v7 }
 0x1bb   : > { %v748_v55 = vpop.xlane.xlu0 %747  ;;  %v858_v40 = vadd.f32 %v2412_v28, %v690_v50  ;;  %v1481_v50 = vsel %vm1065_vm4, %v1480_v38, %v1476_v32 }
 0x1bc   : > { %v887_v45 = vadd.f32 %v2412_v28, %v748_v55  ;;  %v1555_v55 = vsel %vm1058_vm3, %v1554_v44, %v1550_v47  ;;  %v1486_v37 = vsel %vm1072_vm5, %v1485_v39, %v1481_v50 }
 0x1bd   : > { %v1560_v14 = vsel %vm1065_vm4, %v1559_v26, %v1555_v55  ;;  %v1491_v19 = vsel %vm1079_vm6, %v1490_v10, %v1486_v37 }
 0x1be   : > { %v750_v56 = vpop.xlane.xlu1 %749  ;;  %v1638_v15 = vrot.slane %v887_v45, %v2444_v53 }
 0x1bf   : > { %v720_v52 = vpop.xlane.xlu0 %719  ;;  %v888_v49 = vadd.f32 %v2412_v28, %v750_v56  ;;  %v1495_v56 = vrot.slane %v858_v40, %v2479_v22 }
 0x1c0   : > { %v873_v3 = vadd.f32 %v2412_v28, %v720_v52  ;;  %v1634_v52 = vsel %vm1058_vm3, %v1633_v43, %v1629_v1 }
 0x1c1   : > { %v1639_v36 = vsel %vm1065_vm4, %v1638_v15, %v1634_v52 }
 0x1c2   : > { %v722_v57 = vpop.xlane.xlu1 %721  ;;  %v1569_v17 = vrot.slane %v873_v3, %v2463_v7 }
 0x1c3   : > { %v692_v9 = vpop.xlane.xlu0 %691  ;;  %v874_v54 = vadd.f32 %v2412_v28, %v722_v57  ;;  %v1565_v57 = vsel %vm1072_vm5, %v1564_v48, %v1560_v14 }
 0x1c4   : > { %v859_v11 = vadd.f32 %v2412_v28, %v692_v9  ;;  %v1643_v9 = vrot.slane %v888_v49, %v2466_v8  ;;  %v1570_v34 = vsel %vm1079_vm6, %v1569_v17, %v1565_v57 }
 0x1c5   : > { %v1574_v21 = vrot.slane %v874_v54, %v2479_v22 }
 0x1c6   : > { %v694_v58 = vpop.xlane.xlu1 %693  ;;  %v1500_v24 = vrot.slane %v859_v11, %v2488_v31 }
 0x1c7   : > { %v2854_v59 = vpop.xlane.xlu0 %751  ;;  %v860_v16 = vadd.f32 %v2412_v28, %v694_v58  ;;  %v1496_v58 = vsel %vm1086_vm7, %v1495_v56, %v1491_v19  ;;  %v1575_v39 = vsel %vm1086_vm7, %v1574_v21, %v1570_v34 }
 0x1c8   : > { %v889_v27 = vadd.f32 %v2412_v28, %v2854_v59  ;;  %v1501_v23 = vsel %vm1093_vm8, %v1500_v24, %v1496_v58 }
 0x1c9   : > { %v1505_v32 = vrot.slane %v860_v16, %v2499_v46 }
 0x1ca   : > { %v2856_v60 = vpop.xlane.xlu1 %753  ;;  %v1648_v42 = vrot.slane %v889_v27, %v2463_v7 }
 0x1cb   : > { %v724_v61 = vpop.xlane.xlu0 %723  ;;  %v890_v33 = vadd.f32 %v2412_v28, %v2856_v60  ;;  %v1506_v47 = vsel %vm1100_vm9, %v1505_v32, %v1501_v23 }
 0x1cc   : > { %v875_v63 = vadd.f32 %v2412_v28, %v724_v61 }
 0x1cd   : > { %v1653_v48 = vrot.slane %v890_v33, %v2479_v22 }
 0x1ce   : > { %v2858_v0 = vpop.xlane.xlu1 %725  ;;  %v1579_v59 = vrot.slane %v875_v63, %v2488_v31 }
 0x1cf   : > { %v696_v2 = vpop.xlane.xlu0 %695  ;;  %v876_v8 = vadd.f32 %v2412_v28, %v2858_v0 }
 0x1d0   : > { %v861_v53 = vadd.f32 %v2412_v28, %v696_v2  ;;  %v1644_v2 = vsel %vm1072_vm5, %v1643_v9, %v1639_v36 }
 0x1d1   : > { %v1584_v43 = vrot.slane %v876_v8, %v2499_v46 }
 0x1d2   : > { %v698_v12 = vpop.xlane.xlu1 %697  ;;  %v1510_v40 = vrot.slane %v861_v53, %v2506_v51 }
 0x1d3   : > { %v2865_v13 = vpop.xlane.xlu0 %755  ;;  %v862_v61 = vadd.f32 %v2412_v28, %v698_v12 }
 0x1d4   : > { %v891_v7 = vadd.f32 %v2412_v28, %v2865_v13  ;;  %v1511_v54 = vsel %vm1107_vm10, %v1510_v40, %v1506_v47 }
 0x1d5   : > { %v1515_v26 = vrot.slane %v862_v61, %v2515_v62 }
 0x1d6   : > { %v2879_v29 = vpop.xlane.xlu1 %757  ;;  %v1658_v16 = vrot.slane %v891_v7, %v2488_v31  ;;  %v1649_v31 = vsel %vm1079_vm6, %v1648_v42, %v1644_v2 }
 0x1d7   : > { %v728_v30 = vpop.xlane.xlu0 %727  ;;  %v1516_v1 = vsel %vm1114_vm11, %v1515_v26, %v1511_v54  ;;  %v1654_v27 = vsel %vm1086_vm7, %v1653_v48, %v1649_v31 }
 0x1d8   : > { %v877_v60 = vadd.f32 %v2412_v28, %v728_v30  ;;  %v892_v30 = vadd.f32 %v2412_v28, %v2879_v29  ;;  %v1659_v32 = vsel %vm1093_vm8, %v1658_v16, %v1654_v27 }
 0x1da   : > { %v730_v5 = vpop.xlane.xlu1 %729  ;;  %v1589_v22 = vrot.slane %v877_v60, %v2506_v51  ;;  %v1663_v57 = vrot.slane %v892_v30, %v2499_v46 }
 0x1db   : > { %v700_v35 = vpop.xlane.xlu0 %699  ;;  %v878_v45 = vadd.f32 %v2412_v28, %v730_v5 }
 0x1dc   : > { %v863_v38 = vadd.f32 %v2412_v28, %v700_v35  ;;  %v1580_v35 = vsel %vm1093_vm8, %v1579_v59, %v1575_v39 }
 0x1dd   : > { %v1585_v37 = vsel %vm1100_vm9, %v1584_v43, %v1580_v35  ;;  %v1594_v13 = vrot.slane %v878_v45, %v2515_v62 }
 0x1de   : > { %v702_v41 = vpop.xlane.xlu1 %701  ;;  %v1520_v49 = vrot.slane %v863_v38, %v2524_v6 }
 0x1df   : > { %v760_v20 = vpop.xlane.xlu0 %759  ;;  %v864_v0 = vadd.f32 %v2412_v28, %v702_v41 }
 0x1e0   : > { %v893_v29 = vadd.f32 %v2412_v28, %v760_v20  ;;  %v1521_v56 = vsel %vm1121_vm12, %v1520_v49, %v1516_v1  ;;  %v1590_v20 = vsel %vm1107_vm10, %v1589_v22, %v1585_v37 }
 0x1e1   : > { %v1525_v50 = vrot.slane %v864_v0, %v2534_v18  ;;  %v1595_v46 = vsel %vm1114_vm11, %v1594_v13, %v1590_v20 }
 0x1e2   : > { %v762_v44 = vpop.xlane.xlu1 %761  ;;  %v1668_v53 = vrot.slane %v893_v29, %v2506_v51  ;;  %v1664_v51 = vsel %vm1100_vm9, %v1663_v57, %v1659_v32 }
 0x1e3   : > { %v732_v12 = vpop.xlane.xlu0 %731  ;;  %v894_v52 = vadd.f32 %v2412_v28, %v762_v44  ;;  %v1526_v9 = vsel %vm1128_vm13, %v1525_v50, %v1521_v56 }
 0x1e4   : > { %v879_v3 = vadd.f32 %v2412_v28, %v732_v12  ;;  %v1669_v0 = vsel %vm1107_vm10, %v1668_v53, %v1664_v51 }
 0x1e5   : > { %v1673_v8 = vrot.slane %v894_v52, %v2515_v62 }
 0x1e6   : > { %v734_v5 = vpop.xlane.xlu1 %733  ;;  %v1599_v14 = vrot.slane %v879_v3, %v2524_v6 }
 0x1e7   : > { %v704_v10 = vpop.xlane.xlu0 %703  ;;  %v880_v11 = vadd.f32 %v2412_v28, %v734_v5  ;;  %v1674_v12 = vsel %vm1114_vm11, %v1673_v8, %v1669_v0 }
 0x1e8   : > { %v865_v55 = vadd.f32 %v2412_v28, %v704_v10  ;;  %v1600_v61 = vsel %vm1121_vm12, %v1599_v14, %v1595_v46 }
 0x1e9   : > { %v1604_v17 = vrot.slane %v880_v11, %v2534_v18 }
 0x1ea   : > { %v1530_v15 = vrot.slane %v865_v55, %v2541_v25  ;;  %v736_v63 = vpop.xlane.xlu1 %735 }
 0x1eb   : > { %v764_v41 = vpop.xlane.xlu0 %763  ;;  %v881_v21 = vadd.f32 %v2412_v28, %v736_v63  ;;  %v1605_v33 = vsel %vm1128_vm13, %v1604_v17, %v1600_v61 }
 0x1ec   : > { %v1531_v19 = vsel %vm1135_vm14, %v1530_v15, %v1526_v9  ;;  %v895_v24 = vadd.f32 %v2412_v28, %v764_v41 }
 0x1ed   : > { %v1699_v58 = vsel %vm1698_vm0, %v1531_v19, %v2837_v4  ;;  %v1609_v36 = vrot.slane %v881_v21, %v2541_v25 }
 0x1ee   : > { %v1678_v38 = vrot.slane %v895_v24, %v2524_v6  ;;  %v768_v34 = vpop.xlane.xlu1 %767 }
 0x1ef   : > { %v766_v2 = vpop.xlane.xlu0 %765  ;;  %v1610_v4 = vsel %vm1135_vm14, %v1609_v36, %v1605_v33  ;;  %v897_v62 = vadd.f32 %v2412_v28, %v768_v34 }
 0x1f0   : > { %v896_v59 = vadd.f32 %v2412_v28, %v766_v2  ;;  %v1701_v44 = vsel %vm1700_vm1, %v1610_v4, %v1699_v58  ;;  %v1679_v23 = vsel %vm1121_vm12, %v1678_v38, %v1674_v12 }
 0x1f1   : > { %v1688_v39 = vrot.slane %v897_v62, %v2541_v25 }
 0x1f2   : > { %v1683_v6 = vrot.slane %v896_v59, %v2534_v18 }
 0x1f4   : > { %v1684_v28 = vsel %vm1128_vm13, %v1683_v6, %v1679_v23 }
 0x1f5   : > { %v1689_v40 = vsel %vm1135_vm14, %v1688_v39, %v1684_v28 }
 0x1f6   : > { %v1703_v18 = vsel %vm1702_vm2, %v1689_v40, %v1701_v44 }
 0x1f7   : > { %1705 = vst [vmem:[%s246_s29] sm:$0xff] %v1703_v18 }
 0x1f8   : > { %1980 = shalt.err (!%p1977_p0)
}
 0x1f9   : > { %s1981_s1 = scalar_lea.hbm %s3000_s13, 128  ;;  %s1985_s22 = scalar_lea.hbm %s3057_s3, 512 }
 0x1fa   : > { %p1982_p1 = scmp.ne.s32.totalorder %s3000_s13, %s1981_s1  ;;  %p1986_p6 = scmp.lt.u32.totalorder %s3000_s13, %s3057_s3 }
 0x1fb   : > { %p1987_p8 = scmp.lt.u32.totalorder %s1985_s22, %s1981_s1  ;;  %p1989_p13 = scmp.lt.u32.totalorder %s1981_s1, %s3000_s13 }
 0x1fc   : > { %p1983_p5 = pnand %p1982_p1, %p3081_p2 }
 0x1fd   : > { %p1988_p9 = por %p1987_p8, %p1986_p6 }
 0x1fe   : > { %p1984_p3 = pneg %p1983_p5 }
 0x1ff   : > { %p1990_p4 = por %p1989_p13, %p1988_p9 }
 0x201   : > { %p1991_p7 = pnand %p1990_p4, %p1984_p3 }
 0x203   : > { %1994 = shalt.err (!%p1991_p7)
}
 0x204   : > { %1854 = dma.vmem_to_hbm [thread:$0]  (%p3081_p2), %s3002_s8, 128, %s3000_s13, %s1707_s26  }
 0x205 PF: > { %p1866_p10 = scmp.ge.s32.totalorder %s2069_s2, 2  ;;  %s1734_s27 = sand.u32 1, %s2041_s14  }
 0x206   : > { %p3082_p11 = scmp.ne.s32.totalorder %s3073_s6, 0  ;;  %s1735_s28 = scalar_lea.sflag [#allocation5], %s1734_s27 }
 0x208   : > { %p1861_p12 = pnand %p1866_p10, %p3082_p11 }
 0x20a   : > { %2036 = dma.done.wait (!%p1861_p12), %s1735_s28, 128  }
 0x20b   : > { %2038 = vsyncadd (!%p1861_p12), %s1735_s28, 4294967168  ;;  %s21_s2 = sadd.s32 1, %s2069_s2   ;;  %s3083_s30 = sld [smem:[#allocation15_spill]] }
 0x20c   : > { %p18_p0 = scmp.ge.s32.totalorder %s21_s2, 6   ;;  %s3084_s29 = sld [smem:[#allocation16_spill]] }
 0x20d   : > { %s3085_s14 = smov %s2045_s15  ;;  %s3086_s15 = smov %s2049_s16 }
 0x20e   : > { %s3087_s16 = smov %s2186_s7  ;;  %s3088_s17 = smov %s2061_s19 }
 0x20f   : > { %s3089_s18 = smov %s2065_s20  ;;  %20 = sbr.rel (!%p18_p0) target bundleno = 11 (0xb), region = 86 }
 0x211   : > { %s3090_s19 = smov %s3083_s30 }
 0x212   : > { %s3091_s20 = smov %s3084_s29 }
 0x216   :  { %1740 = vsyncpa [#allocation4], 1 }
 0x217   :  { %1742 = vsyncpa [#allocation4 + $0x1], 1 }
 0x218   :  { %1743 = vsyncpa [#allocation7], 1 }
 0x219   :  { %1744 = vsyncpa [#allocation5], 1 }
 0x21a   :  { %1746 = vsyncpa [#allocation5 + $0x1], 1 }

</bundles_post_ra>
